<compile_context>
chip_gen: v5e
topology: v5e:2x2
jax: 0.10.0
libtpu: 0.0.40
codegen_flags: <defaults>
</compile_context>

<pallas_src>
import math
import functools

import jax
import jax.numpy as jnp
import numpy as np
from jax.experimental import pallas as pl
from jax.experimental.pallas import tpu as pltpu


def _cross_attn_kernel(x_ref, c_ref,
                       qw_ref, qb_ref,
                       kw_ref, kb_ref,
                       vw_ref, vb_ref,
                       ow_ref, ob_ref,
                       o_ref,
                       *, bt: int, nx: int, nc: int,
                       num_heads: int, head_dim: int):
    cdt = x_ref.dtype                     # MXU operand dtype (bf16 when model is bf16)
    hidden = num_heads * head_dim
    scale = 1.0 / math.sqrt(head_dim)

    x2 = x_ref[...]                       # (bt*nx, H)
    c2 = c_ref[...]                       # (bt*nc, H)

    # Q/K/V projections: full-block 2-D MXU matmuls, f32 accumulation.
    q = jnp.dot(x2, qw_ref[...], preferred_element_type=jnp.float32) + qb_ref[...]
    q = (q * scale).astype(cdt)           # fold 1/sqrt(head_dim) into Q once
    k = (jnp.dot(c2, kw_ref[...], preferred_element_type=jnp.float32)
         + kb_ref[...]).astype(cdt)
    v = (jnp.dot(c2, vw_ref[...], preferred_element_type=jnp.float32)
         + vb_ref[...]).astype(cdt)

    q3 = q.reshape(bt, nx, hidden)        # leading-dim split only (layout cheap)
    k3 = k.reshape(bt, nc, hidden)
    v3 = v.reshape(bt, nc, hidden)
    ow = ow_ref[...]                      # (H, H)

    # Accumulate the output projection head-by-head (no concat, one head live).
    y = jnp.zeros((bt * nx, hidden), jnp.float32)
    for h in range(num_heads):            # static unroll; num_heads is small
        lo = h * head_dim
        qh = q3[:, :, lo:lo + head_dim]   # (bt, nx, hd)
        kh = k3[:, :, lo:lo + head_dim]   # (bt, nc, hd)
        vh = v3[:, :, lo:lo + head_dim]   # (bt, nc, hd)

        # Scores: contract last dims directly -> no transpose materialized.
        s = jnp.einsum('bqd,bkd->bqk', qh, kh,
                       preferred_element_type=jnp.float32)      # (bt, nx, nc)
        s = s - jnp.max(s, axis=-1, keepdims=True)
        p = jnp.exp(s)
        p = p * pl.reciprocal(jnp.sum(p, axis=-1, keepdims=True), approx=True)

        oh = jnp.einsum('bqk,bkd->bqd', p.astype(cdt), vh,
                        preferred_element_type=jnp.float32)     # (bt, nx, hd)

        # Fold this head straight into the output projection.
        y = y + jnp.dot(oh.reshape(bt * nx, head_dim).astype(cdt),
                        ow[lo:lo + head_dim, :],
                        preferred_element_type=jnp.float32)

    y = y + ob_ref[...]
    o_ref[...] = y.astype(o_ref.dtype)


def _pick_batch_tile(B: int, Nx: int, Nc: int,
                     target_rows: int = 512, min_rows_per_step: int = 128) -> int:
    """Largest divisor Bt of B whose Q-row block stays within target_rows, while
    keeping sub-full blocks (8,128)-legal. Prefer >=2 grid steps (v7x has two
    TensorCores) when each step still gets a reasonable number of rows."""
    divisors = [d for d in range(1, B + 1) if B % d == 0]
    ok = [d for d in divisors
          if d * Nx <= target_rows
          and (d == B or ((d * Nx) % 8 == 0 and (d * Nc) % 8 == 0))]
    bt = max(ok) if ok else B
    if B // bt < 2:
        smaller = [d for d in ok if B // d >= 2 and d * Nx >= min_rows_per_step]
        if smaller:
            bt = max(smaller)
    return bt


def custom_cross_attention(x, cond, params, *, num_heads: int):
    """x: (B, Nx, H), cond: (B, Nc, H) or (B, H)."""
    if cond.ndim == 2:
        cond = cond[:, None, :]

    B, Nx, H = x.shape
    Nc = cond.shape[1]
    if H % num_heads != 0:
        raise ValueError(f"hidden_size {H} not divisible by num_heads {num_heads}")
    head_dim = H // num_heads

    qw, qb, kw, kb, vw, vb, ow, ob = params
    # Biases as (1, H) so they live as 2-D VMEM tiles.
    qb2, kb2, vb2, ob2 = (b.reshape(1, H) for b in (qb, kb, vb, ob))

    # Lane-dense 2-D slabs: (B*Nx, H) / (B*Nc, H); grid tiles Bt batches per step.
    bt = _pick_batch_tile(B, Nx, Nc)
    grid = (B // bt,)
    x2 = x.reshape(B * Nx, H)
    c2 = cond.reshape(B * Nc, H)

    kernel = functools.partial(_cross_attn_kernel, bt=bt, nx=Nx, nc=Nc,
                               num_heads=num_heads, head_dim=head_dim)

    # NOTE: the four (H, H) weights have a constant block index; for large H they
    # should additionally be single-buffered (pipeline_mode=pl.Buffered(1)) or
    # tiled over an output-column grid axis so a weight-resident config also fits
    # v7x's 64 MiB VMEM. At the sizes exercised here they are a few KiB.
    w_spec = pl.BlockSpec((H, H), lambda i: (0, 0))
    b_spec = pl.BlockSpec((1, H), lambda i: (0, 0))

    # Cost estimate for XLA scheduling around the custom call.
    flops = int(2 * B * (Nx * H * H + 2 * Nc * H * H + 2 * Nx * Nc * H + Nx * H * H))
    transcendentals = int(B * num_heads * Nx * Nc)
    io_itemsize = jnp.dtype(x.dtype).itemsize
    w_itemsize = jnp.dtype(qw.dtype).itemsize
    bytes_accessed = int(io_itemsize * (2 * B * Nx * H + B * Nc * H)
                         + w_itemsize * (4 * H * H + 4 * H))

    # VMEM budget: double-buffered I/O + weight blocks plus f32 intermediates,
    # with headroom; clamp to [32 MiB default, 64 MiB] so it stays legal on v7x.
    io_block_bytes = (2 * bt * Nx * H + bt * Nc * H) * io_itemsize
    w_bytes = (4 * H * H + 4 * H) * w_itemsize
    interm_bytes = 4 * (4 * bt * Nx * H + 2 * bt * Nc * H + bt * Nx * Nc)
    vmem_est = 2 * (io_block_bytes + w_bytes) + interm_bytes
    vmem_limit = int(min(max(4 * vmem_est, 32 * 1024 * 1024), 64 * 1024 * 1024))

    out2 = pl.pallas_call(
        kernel,
        out_shape=jax.ShapeDtypeStruct((B * Nx, H), x.dtype),
        grid_spec=pltpu.PrefetchScalarGridSpec(
            num_scalar_prefetch=0,
            grid=grid,
            in_specs=[
                pl.BlockSpec((bt * Nx, H), lambda i: (i, 0)),   # x rows
                pl.BlockSpec((bt * Nc, H), lambda i: (i, 0)),   # cond rows
                w_spec, b_spec,                                  # q_proj
                w_spec, b_spec,                                  # k_proj
                w_spec, b_spec,                                  # v_proj
                w_spec, b_spec,                                  # out_proj
            ],
            out_specs=pl.BlockSpec((bt * Nx, H), lambda i: (i, 0)),
        ),
        compiler_params=pltpu.CompilerParams(
            dimension_semantics=("parallel",),
            vmem_limit_bytes=vmem_limit),
        cost_estimate=pl.CostEstimate(flops=flops,
                                      transcendentals=transcendentals,
                                      bytes_accessed=bytes_accessed),
    )(x2, c2, qw, qb2, kw, kb2, vw, vb2, ow, ob2)

    return out2.reshape(B, Nx, H)


def _reference(x, cond, params, *, num_heads: int):
    """Pure-JAX reference matching the PyTorch forward exactly."""
    if cond.ndim == 2:
        cond = cond[:, None, :]
    qw, qb, kw, kb, vw, vb, ow, ob = params
    B, Nx, H = x.shape
    Nc = cond.shape[1]
    hd = H // num_heads

    Q = (x @ qw + qb).reshape(B, Nx, num_heads, hd).transpose(0, 2, 1, 3)
    K = (cond @ kw + kb).reshape(B, Nc, num_heads, hd).transpose(0, 2, 1, 3)
    V = (cond @ vw + vb).reshape(B, Nc, num_heads, hd).transpose(0, 2, 1, 3)

    s = jnp.einsum("bhqd,bhkd->bhqk", Q, K) / math.sqrt(hd)
    p = jax.nn.softmax(s, axis=-1)
    o = jnp.einsum("bhqk,bhkd->bhqd", p, V)
    o = o.transpose(0, 2, 1, 3).reshape(B, Nx, H)
    return o @ ow + ob


if __name__ == "__main__":
    # Small, forward-consistent shapes.
    B, Nx, Nc, H = 2, 16, 8, 32
    num_heads = 8

    key = jax.random.PRNGKey(0)
    keys = jax.random.split(key, 10)

    x = jax.random.normal(keys[0], (B, Nx, H), dtype=jnp.float32)
    cond = jax.random.normal(keys[1], (B, Nc, H), dtype=jnp.float32)

    # Deterministic parameter init (Linear: weight (in, out), bias (out,)).
    scale = 1.0 / math.sqrt(H)
    qw = jax.random.normal(keys[2], (H, H), dtype=jnp.float32) * scale
    kw = jax.random.normal(keys[3], (H, H), dtype=jnp.float32) * scale
    vw = jax.random.normal(keys[4], (H, H), dtype=jnp.float32) * scale
    ow = jax.random.normal(keys[5], (H, H), dtype=jnp.float32) * scale
    qb = jax.random.normal(keys[6], (H,), dtype=jnp.float32) * scale
    kb = jax.random.normal(keys[7], (H,), dtype=jnp.float32) * scale
    vb = jax.random.normal(keys[8], (H,), dtype=jnp.float32) * scale
    ob = jax.random.normal(keys[9], (H,), dtype=jnp.float32) * scale

    params = (qw, qb, kw, kb, vw, vb, ow, ob)

    out = custom_cross_attention(x, cond, params, num_heads=num_heads)
    out = jax.block_until_ready(out)

    ref = _reference(x, cond, params, num_heads=num_heads)
    # Tolerance relaxed for the EUP approx-reciprocal softmax denominator.
    np.testing.assert_allclose(np.asarray(out), np.asarray(ref),
                               rtol=1e-2, atol=1e-2)

    print("KERNEL_OK")
</pallas_src>

<mosaic_0001>
module attributes {stable_mosaic.version = 11 : i64} {
  func.func @_cross_attn_kernel(%arg0: i32, %arg1: memref<32x32xf32, #tpu.memory_space<vmem>>, %arg2: memref<16x32xf32, #tpu.memory_space<vmem>>, %arg3: memref<32x32xf32, #tpu.memory_space<vmem>>, %arg4: memref<1x32xf32, #tpu.memory_space<vmem>>, %arg5: memref<32x32xf32, #tpu.memory_space<vmem>>, %arg6: memref<1x32xf32, #tpu.memory_space<vmem>>, %arg7: memref<32x32xf32, #tpu.memory_space<vmem>>, %arg8: memref<1x32xf32, #tpu.memory_space<vmem>>, %arg9: memref<32x32xf32, #tpu.memory_space<vmem>>, %arg10: memref<1x32xf32, #tpu.memory_space<vmem>>, %arg11: memref<32x32xf32, #tpu.memory_space<vmem>>) attributes {dimension_semantics = [#tpu.dimension_semantics<parallel>], iteration_bounds = array<i64: 1>, scalar_prefetch = 0 : i64, scratch_operands = 0 : i64, tpu.core_type = #tpu.core_type<tc>, window_params = [{transform_indices = @transform_0, window_bounds = array<i64: 32, 32>}, {transform_indices = @transform_1, window_bounds = array<i64: 16, 32>}, {pipeline_mode = #tpu.pipeline_mode<synchronous>, transform_indices = @transform_2, window_bounds = array<i64: 32, 32>}, {pipeline_mode = #tpu.pipeline_mode<synchronous>, transform_indices = @transform_3, window_bounds = array<i64: 1, 32>}, {pipeline_mode = #tpu.pipeline_mode<synchronous>, transform_indices = @transform_4, window_bounds = array<i64: 32, 32>}, {pipeline_mode = #tpu.pipeline_mode<synchronous>, transform_indices = @transform_5, window_bounds = array<i64: 1, 32>}, {pipeline_mode = #tpu.pipeline_mode<synchronous>, transform_indices = @transform_6, window_bounds = array<i64: 32, 32>}, {pipeline_mode = #tpu.pipeline_mode<synchronous>, transform_indices = @transform_7, window_bounds = array<i64: 1, 32>}, {pipeline_mode = #tpu.pipeline_mode<synchronous>, transform_indices = @transform_8, window_bounds = array<i64: 32, 32>}, {pipeline_mode = #tpu.pipeline_mode<synchronous>, transform_indices = @transform_9, window_bounds = array<i64: 1, 32>}, {transform_indices = @transform_10, window_bounds = array<i64: 32, 32>}]} {
    %c0 = arith.constant 0 : index
    %c0_0 = arith.constant 0 : index
    %0 = vector.load %arg1[%c0, %c0_0] : memref<32x32xf32, #tpu.memory_space<vmem>>, vector<32x32xf32>
    %c0_1 = arith.constant 0 : index
    %c0_2 = arith.constant 0 : index
    %1 = vector.load %arg2[%c0_1, %c0_2] : memref<16x32xf32, #tpu.memory_space<vmem>>, vector<16x32xf32>
    %c0_3 = arith.constant 0 : index
    %c0_4 = arith.constant 0 : index
    %2 = vector.load %arg3[%c0_3, %c0_4] : memref<32x32xf32, #tpu.memory_space<vmem>>, vector<32x32xf32>
    %cst = arith.constant dense<0.000000e+00> : vector<32x32xf32>
    %3 = tpu.matmul %0, %2, %cst {dimension_numbers = #tpu.dot_dimension_numbers<[1], [0], [0], [1], [0, 0, 1, 1], [], []>} : vector<32x32xf32>, vector<32x32xf32>, vector<32x32xf32> -> vector<32x32xf32>
    %c0_5 = arith.constant 0 : index
    %c0_6 = arith.constant 0 : index
    %4 = vector.load %arg4[%c0_5, %c0_6] : memref<1x32xf32, #tpu.memory_space<vmem>>, vector<1x32xf32>
    %5 = vector.broadcast %4 : vector<1x32xf32> to vector<32x32xf32>
    %6 = arith.addf %3, %5 : vector<32x32xf32>
    %cst_7 = arith.constant 5.000000e-01 : f32
    %7 = vector.broadcast %cst_7 : f32 to vector<32x32xf32>
    %8 = arith.mulf %6, %7 : vector<32x32xf32>
    %c0_8 = arith.constant 0 : index
    %c0_9 = arith.constant 0 : index
    %9 = vector.load %arg5[%c0_8, %c0_9] : memref<32x32xf32, #tpu.memory_space<vmem>>, vector<32x32xf32>
    %cst_10 = arith.constant dense<0.000000e+00> : vector<16x32xf32>
    %10 = tpu.matmul %1, %9, %cst_10 {dimension_numbers = #tpu.dot_dimension_numbers<[1], [0], [0], [1], [0, 0, 1, 1], [], []>} : vector<16x32xf32>, vector<32x32xf32>, vector<16x32xf32> -> vector<16x32xf32>
    %c0_11 = arith.constant 0 : index
    %c0_12 = arith.constant 0 : index
    %11 = vector.load %arg6[%c0_11, %c0_12] : memref<1x32xf32, #tpu.memory_space<vmem>>, vector<1x32xf32>
    %12 = vector.broadcast %11 : vector<1x32xf32> to vector<16x32xf32>
    %13 = arith.addf %10, %12 : vector<16x32xf32>
    %c0_13 = arith.constant 0 : index
    %c0_14 = arith.constant 0 : index
    %14 = vector.load %arg7[%c0_13, %c0_14] : memref<32x32xf32, #tpu.memory_space<vmem>>, vector<32x32xf32>
    %cst_15 = arith.constant dense<0.000000e+00> : vector<16x32xf32>
    %15 = tpu.matmul %1, %14, %cst_15 {dimension_numbers = #tpu.dot_dimension_numbers<[1], [0], [0], [1], [0, 0, 1, 1], [], []>} : vector<16x32xf32>, vector<32x32xf32>, vector<16x32xf32> -> vector<16x32xf32>
    %c0_16 = arith.constant 0 : index
    %c0_17 = arith.constant 0 : index
    %16 = vector.load %arg8[%c0_16, %c0_17] : memref<1x32xf32, #tpu.memory_space<vmem>>, vector<1x32xf32>
    %17 = vector.broadcast %16 : vector<1x32xf32> to vector<16x32xf32>
    %18 = arith.addf %15, %17 : vector<16x32xf32>
    %19 = vector.shape_cast %8 : vector<32x32xf32> to vector<2x16x32xf32>
    %20 = vector.shape_cast %13 : vector<16x32xf32> to vector<2x8x32xf32>
    %21 = vector.shape_cast %18 : vector<16x32xf32> to vector<2x8x32xf32>
    %c0_18 = arith.constant 0 : index
    %c0_19 = arith.constant 0 : index
    %22 = vector.load %arg9[%c0_18, %c0_19] : memref<32x32xf32, #tpu.memory_space<vmem>>, vector<32x32xf32>
    %cst_20 = arith.constant 0.000000e+00 : f32
    %23 = vector.broadcast %cst_20 : f32 to vector<32x32xf32>
    %24 = vector.extract_strided_slice %19 {offsets = [0, 0, 0], sizes = [2, 16, 4], strides = [1, 1, 1]} : vector<2x16x32xf32> to vector<2x16x4xf32>
    %25 = vector.extract_strided_slice %20 {offsets = [0, 0, 0], sizes = [2, 8, 4], strides = [1, 1, 1]} : vector<2x8x32xf32> to vector<2x8x4xf32>
    %26 = vector.extract_strided_slice %21 {offsets = [0, 0, 0], sizes = [2, 8, 4], strides = [1, 1, 1]} : vector<2x8x32xf32> to vector<2x8x4xf32>
    "tpu.trace_start"() <{level = 10 : i32, message = "bqd,bkd->bqk"}> : () -> ()
    %cst_21 = arith.constant dense<0.000000e+00> : vector<2x16x8xf32>
    %27 = tpu.matmul %24, %25, %cst_21 {dimension_numbers = #tpu.dot_dimension_numbers<[2], [2], [1], [1], [0, 0, 0, 1, 1, 1], [0], [0]>} : vector<2x16x4xf32>, vector<2x8x4xf32>, vector<2x16x8xf32> -> vector<2x16x8xf32>
    "tpu.trace_stop"() : () -> ()
    %cst_22 = arith.constant dense<0xFF800000> : vector<2x16xf32>
    %28 = vector.multi_reduction <maximumf>, %27, %cst_22 [2] : vector<2x16x8xf32> to vector<2x16xf32>
    %29 = vector.shape_cast %28 : vector<2x16xf32> to vector<2x16x1xf32>
    %30 = vector.broadcast %29 : vector<2x16x1xf32> to vector<2x16x8xf32>
    %31 = arith.subf %27, %30 : vector<2x16x8xf32>
    %32 = math.exp %31 : vector<2x16x8xf32>
    %cst_23 = arith.constant dense<0.000000e+00> : vector<2x16xf32>
    %33 = vector.multi_reduction <add>, %32, %cst_23 [2] : vector<2x16x8xf32> to vector<2x16xf32>
    %34 = vector.shape_cast %33 : vector<2x16xf32> to vector<2x16x1xf32>
    %35 = tpu.reciprocal %34 {approx = true} : vector<2x16x1xf32> -> vector<2x16x1xf32>
    %36 = vector.broadcast %35 : vector<2x16x1xf32> to vector<2x16x8xf32>
    %37 = arith.mulf %32, %36 : vector<2x16x8xf32>
    "tpu.trace_start"() <{level = 10 : i32, message = "bqk,bkd->bqd"}> : () -> ()
    %cst_24 = arith.constant dense<0.000000e+00> : vector<2x16x4xf32>
    %38 = tpu.matmul %37, %26, %cst_24 {dimension_numbers = #tpu.dot_dimension_numbers<[2], [1], [1], [2], [0, 0, 0, 1, 1, 2], [0], [0]>} : vector<2x16x8xf32>, vector<2x8x4xf32>, vector<2x16x4xf32> -> vector<2x16x4xf32>
    "tpu.trace_stop"() : () -> ()
    %39 = vector.shape_cast %38 : vector<2x16x4xf32> to vector<32x4xf32>
    %40 = vector.extract_strided_slice %22 {offsets = [0, 0], sizes = [4, 32], strides = [1, 1]} : vector<32x32xf32> to vector<4x32xf32>
    %cst_25 = arith.constant dense<0.000000e+00> : vector<32x32xf32>
    %41 = tpu.matmul %39, %40, %cst_25 {dimension_numbers = #tpu.dot_dimension_numbers<[1], [0], [0], [1], [0, 0, 1, 1], [], []>} : vector<32x4xf32>, vector<4x32xf32>, vector<32x32xf32> -> vector<32x32xf32>
    %42 = arith.addf %23, %41 : vector<32x32xf32>
    %43 = vector.extract_strided_slice %19 {offsets = [0, 0, 4], sizes = [2, 16, 4], strides = [1, 1, 1]} : vector<2x16x32xf32> to vector<2x16x4xf32>
    %44 = vector.extract_strided_slice %20 {offsets = [0, 0, 4], sizes = [2, 8, 4], strides = [1, 1, 1]} : vector<2x8x32xf32> to vector<2x8x4xf32>
    %45 = vector.extract_strided_slice %21 {offsets = [0, 0, 4], sizes = [2, 8, 4], strides = [1, 1, 1]} : vector<2x8x32xf32> to vector<2x8x4xf32>
    "tpu.trace_start"() <{level = 10 : i32, message = "bqd,bkd->bqk"}> : () -> ()
    %cst_26 = arith.constant dense<0.000000e+00> : vector<2x16x8xf32>
    %46 = tpu.matmul %43, %44, %cst_26 {dimension_numbers = #tpu.dot_dimension_numbers<[2], [2], [1], [1], [0, 0, 0, 1, 1, 1], [0], [0]>} : vector<2x16x4xf32>, vector<2x8x4xf32>, vector<2x16x8xf32> -> vector<2x16x8xf32>
    "tpu.trace_stop"() : () -> ()
    %cst_27 = arith.constant dense<0xFF800000> : vector<2x16xf32>
    %47 = vector.multi_reduction <maximumf>, %46, %cst_27 [2] : vector<2x16x8xf32> to vector<2x16xf32>
    %48 = vector.shape_cast %47 : vector<2x16xf32> to vector<2x16x1xf32>
    %49 = vector.broadcast %48 : vector<2x16x1xf32> to vector<2x16x8xf32>
    %50 = arith.subf %46, %49 : vector<2x16x8xf32>
    %51 = math.exp %50 : vector<2x16x8xf32>
    %cst_28 = arith.constant dense<0.000000e+00> : vector<2x16xf32>
    %52 = vector.multi_reduction <add>, %51, %cst_28 [2] : vector<2x16x8xf32> to vector<2x16xf32>
    %53 = vector.shape_cast %52 : vector<2x16xf32> to vector<2x16x1xf32>
    %54 = tpu.reciprocal %53 {approx = true} : vector<2x16x1xf32> -> vector<2x16x1xf32>
    %55 = vector.broadcast %54 : vector<2x16x1xf32> to vector<2x16x8xf32>
    %56 = arith.mulf %51, %55 : vector<2x16x8xf32>
    "tpu.trace_start"() <{level = 10 : i32, message = "bqk,bkd->bqd"}> : () -> ()
    %cst_29 = arith.constant dense<0.000000e+00> : vector<2x16x4xf32>
    %57 = tpu.matmul %56, %45, %cst_29 {dimension_numbers = #tpu.dot_dimension_numbers<[2], [1], [1], [2], [0, 0, 0, 1, 1, 2], [0], [0]>} : vector<2x16x8xf32>, vector<2x8x4xf32>, vector<2x16x4xf32> -> vector<2x16x4xf32>
    "tpu.trace_stop"() : () -> ()
    %58 = vector.shape_cast %57 : vector<2x16x4xf32> to vector<32x4xf32>
    %59 = vector.extract_strided_slice %22 {offsets = [4, 0], sizes = [4, 32], strides = [1, 1]} : vector<32x32xf32> to vector<4x32xf32>
    %cst_30 = arith.constant dense<0.000000e+00> : vector<32x32xf32>
    %60 = tpu.matmul %58, %59, %cst_30 {dimension_numbers = #tpu.dot_dimension_numbers<[1], [0], [0], [1], [0, 0, 1, 1], [], []>} : vector<32x4xf32>, vector<4x32xf32>, vector<32x32xf32> -> vector<32x32xf32>
    %61 = arith.addf %42, %60 : vector<32x32xf32>
    %62 = vector.extract_strided_slice %19 {offsets = [0, 0, 8], sizes = [2, 16, 4], strides = [1, 1, 1]} : vector<2x16x32xf32> to vector<2x16x4xf32>
    %63 = vector.extract_strided_slice %20 {offsets = [0, 0, 8], sizes = [2, 8, 4], strides = [1, 1, 1]} : vector<2x8x32xf32> to vector<2x8x4xf32>
    %64 = vector.extract_strided_slice %21 {offsets = [0, 0, 8], sizes = [2, 8, 4], strides = [1, 1, 1]} : vector<2x8x32xf32> to vector<2x8x4xf32>
    "tpu.trace_start"() <{level = 10 : i32, message = "bqd,bkd->bqk"}> : () -> ()
    %cst_31 = arith.constant dense<0.000000e+00> : vector<2x16x8xf32>
    %65 = tpu.matmul %62, %63, %cst_31 {dimension_numbers = #tpu.dot_dimension_numbers<[2], [2], [1], [1], [0, 0, 0, 1, 1, 1], [0], [0]>} : vector<2x16x4xf32>, vector<2x8x4xf32>, vector<2x16x8xf32> -> vector<2x16x8xf32>
    "tpu.trace_stop"() : () -> ()
    %cst_32 = arith.constant dense<0xFF800000> : vector<2x16xf32>
    %66 = vector.multi_reduction <maximumf>, %65, %cst_32 [2] : vector<2x16x8xf32> to vector<2x16xf32>
    %67 = vector.shape_cast %66 : vector<2x16xf32> to vector<2x16x1xf32>
    %68 = vector.broadcast %67 : vector<2x16x1xf32> to vector<2x16x8xf32>
    %69 = arith.subf %65, %68 : vector<2x16x8xf32>
    %70 = math.exp %69 : vector<2x16x8xf32>
    %cst_33 = arith.constant dense<0.000000e+00> : vector<2x16xf32>
    %71 = vector.multi_reduction <add>, %70, %cst_33 [2] : vector<2x16x8xf32> to vector<2x16xf32>
    %72 = vector.shape_cast %71 : vector<2x16xf32> to vector<2x16x1xf32>
    %73 = tpu.reciprocal %72 {approx = true} : vector<2x16x1xf32> -> vector<2x16x1xf32>
    %74 = vector.broadcast %73 : vector<2x16x1xf32> to vector<2x16x8xf32>
    %75 = arith.mulf %70, %74 : vector<2x16x8xf32>
    "tpu.trace_start"() <{level = 10 : i32, message = "bqk,bkd->bqd"}> : () -> ()
    %cst_34 = arith.constant dense<0.000000e+00> : vector<2x16x4xf32>
    %76 = tpu.matmul %75, %64, %cst_34 {dimension_numbers = #tpu.dot_dimension_numbers<[2], [1], [1], [2], [0, 0, 0, 1, 1, 2], [0], [0]>} : vector<2x16x8xf32>, vector<2x8x4xf32>, vector<2x16x4xf32> -> vector<2x16x4xf32>
    "tpu.trace_stop"() : () -> ()
    %77 = vector.shape_cast %76 : vector<2x16x4xf32> to vector<32x4xf32>
    %78 = vector.extract_strided_slice %22 {offsets = [8, 0], sizes = [4, 32], strides = [1, 1]} : vector<32x32xf32> to vector<4x32xf32>
    %cst_35 = arith.constant dense<0.000000e+00> : vector<32x32xf32>
    %79 = tpu.matmul %77, %78, %cst_35 {dimension_numbers = #tpu.dot_dimension_numbers<[1], [0], [0], [1], [0, 0, 1, 1], [], []>} : vector<32x4xf32>, vector<4x32xf32>, vector<32x32xf32> -> vector<32x32xf32>
    %80 = arith.addf %61, %79 : vector<32x32xf32>
    %81 = vector.extract_strided_slice %19 {offsets = [0, 0, 12], sizes = [2, 16, 4], strides = [1, 1, 1]} : vector<2x16x32xf32> to vector<2x16x4xf32>
    %82 = vector.extract_strided_slice %20 {offsets = [0, 0, 12], sizes = [2, 8, 4], strides = [1, 1, 1]} : vector<2x8x32xf32> to vector<2x8x4xf32>
    %83 = vector.extract_strided_slice %21 {offsets = [0, 0, 12], sizes = [2, 8, 4], strides = [1, 1, 1]} : vector<2x8x32xf32> to vector<2x8x4xf32>
    "tpu.trace_start"() <{level = 10 : i32, message = "bqd,bkd->bqk"}> : () -> ()
    %cst_36 = arith.constant dense<0.000000e+00> : vector<2x16x8xf32>
    %84 = tpu.matmul %81, %82, %cst_36 {dimension_numbers = #tpu.dot_dimension_numbers<[2], [2], [1], [1], [0, 0, 0, 1, 1, 1], [0], [0]>} : vector<2x16x4xf32>, vector<2x8x4xf32>, vector<2x16x8xf32> -> vector<2x16x8xf32>
    "tpu.trace_stop"() : () -> ()
    %cst_37 = arith.constant dense<0xFF800000> : vector<2x16xf32>
    %85 = vector.multi_reduction <maximumf>, %84, %cst_37 [2] : vector<2x16x8xf32> to vector<2x16xf32>
    %86 = vector.shape_cast %85 : vector<2x16xf32> to vector<2x16x1xf32>
    %87 = vector.broadcast %86 : vector<2x16x1xf32> to vector<2x16x8xf32>
    %88 = arith.subf %84, %87 : vector<2x16x8xf32>
    %89 = math.exp %88 : vector<2x16x8xf32>
    %cst_38 = arith.constant dense<0.000000e+00> : vector<2x16xf32>
    %90 = vector.multi_reduction <add>, %89, %cst_38 [2] : vector<2x16x8xf32> to vector<2x16xf32>
    %91 = vector.shape_cast %90 : vector<2x16xf32> to vector<2x16x1xf32>
    %92 = tpu.reciprocal %91 {approx = true} : vector<2x16x1xf32> -> vector<2x16x1xf32>
    %93 = vector.broadcast %92 : vector<2x16x1xf32> to vector<2x16x8xf32>
    %94 = arith.mulf %89, %93 : vector<2x16x8xf32>
    "tpu.trace_start"() <{level = 10 : i32, message = "bqk,bkd->bqd"}> : () -> ()
    %cst_39 = arith.constant dense<0.000000e+00> : vector<2x16x4xf32>
    %95 = tpu.matmul %94, %83, %cst_39 {dimension_numbers = #tpu.dot_dimension_numbers<[2], [1], [1], [2], [0, 0, 0, 1, 1, 2], [0], [0]>} : vector<2x16x8xf32>, vector<2x8x4xf32>, vector<2x16x4xf32> -> vector<2x16x4xf32>
    "tpu.trace_stop"() : () -> ()
    %96 = vector.shape_cast %95 : vector<2x16x4xf32> to vector<32x4xf32>
    %97 = vector.extract_strided_slice %22 {offsets = [12, 0], sizes = [4, 32], strides = [1, 1]} : vector<32x32xf32> to vector<4x32xf32>
    %cst_40 = arith.constant dense<0.000000e+00> : vector<32x32xf32>
    %98 = tpu.matmul %96, %97, %cst_40 {dimension_numbers = #tpu.dot_dimension_numbers<[1], [0], [0], [1], [0, 0, 1, 1], [], []>} : vector<32x4xf32>, vector<4x32xf32>, vector<32x32xf32> -> vector<32x32xf32>
    %99 = arith.addf %80, %98 : vector<32x32xf32>
    %100 = vector.extract_strided_slice %19 {offsets = [0, 0, 16], sizes = [2, 16, 4], strides = [1, 1, 1]} : vector<2x16x32xf32> to vector<2x16x4xf32>
    %101 = vector.extract_strided_slice %20 {offsets = [0, 0, 16], sizes = [2, 8, 4], strides = [1, 1, 1]} : vector<2x8x32xf32> to vector<2x8x4xf32>
    %102 = vector.extract_strided_slice %21 {offsets = [0, 0, 16], sizes = [2, 8, 4], strides = [1, 1, 1]} : vector<2x8x32xf32> to vector<2x8x4xf32>
    "tpu.trace_start"() <{level = 10 : i32, message = "bqd,bkd->bqk"}> : () -> ()
    %cst_41 = arith.constant dense<0.000000e+00> : vector<2x16x8xf32>
    %103 = tpu.matmul %100, %101, %cst_41 {dimension_numbers = #tpu.dot_dimension_numbers<[2], [2], [1], [1], [0, 0, 0, 1, 1, 1], [0], [0]>} : vector<2x16x4xf32>, vector<2x8x4xf32>, vector<2x16x8xf32> -> vector<2x16x8xf32>
    "tpu.trace_stop"() : () -> ()
    %cst_42 = arith.constant dense<0xFF800000> : vector<2x16xf32>
    %104 = vector.multi_reduction <maximumf>, %103, %cst_42 [2] : vector<2x16x8xf32> to vector<2x16xf32>
    %105 = vector.shape_cast %104 : vector<2x16xf32> to vector<2x16x1xf32>
    %106 = vector.broadcast %105 : vector<2x16x1xf32> to vector<2x16x8xf32>
    %107 = arith.subf %103, %106 : vector<2x16x8xf32>
    %108 = math.exp %107 : vector<2x16x8xf32>
    %cst_43 = arith.constant dense<0.000000e+00> : vector<2x16xf32>
    %109 = vector.multi_reduction <add>, %108, %cst_43 [2] : vector<2x16x8xf32> to vector<2x16xf32>
    %110 = vector.shape_cast %109 : vector<2x16xf32> to vector<2x16x1xf32>
    %111 = tpu.reciprocal %110 {approx = true} : vector<2x16x1xf32> -> vector<2x16x1xf32>
    %112 = vector.broadcast %111 : vector<2x16x1xf32> to vector<2x16x8xf32>
    %113 = arith.mulf %108, %112 : vector<2x16x8xf32>
    "tpu.trace_start"() <{level = 10 : i32, message = "bqk,bkd->bqd"}> : () -> ()
    %cst_44 = arith.constant dense<0.000000e+00> : vector<2x16x4xf32>
    %114 = tpu.matmul %113, %102, %cst_44 {dimension_numbers = #tpu.dot_dimension_numbers<[2], [1], [1], [2], [0, 0, 0, 1, 1, 2], [0], [0]>} : vector<2x16x8xf32>, vector<2x8x4xf32>, vector<2x16x4xf32> -> vector<2x16x4xf32>
    "tpu.trace_stop"() : () -> ()
    %115 = vector.shape_cast %114 : vector<2x16x4xf32> to vector<32x4xf32>
    %116 = vector.extract_strided_slice %22 {offsets = [16, 0], sizes = [4, 32], strides = [1, 1]} : vector<32x32xf32> to vector<4x32xf32>
    %cst_45 = arith.constant dense<0.000000e+00> : vector<32x32xf32>
    %117 = tpu.matmul %115, %116, %cst_45 {dimension_numbers = #tpu.dot_dimension_numbers<[1], [0], [0], [1], [0, 0, 1, 1], [], []>} : vector<32x4xf32>, vector<4x32xf32>, vector<32x32xf32> -> vector<32x32xf32>
    %118 = arith.addf %99, %117 : vector<32x32xf32>
    %119 = vector.extract_strided_slice %19 {offsets = [0, 0, 20], sizes = [2, 16, 4], strides = [1, 1, 1]} : vector<2x16x32xf32> to vector<2x16x4xf32>
    %120 = vector.extract_strided_slice %20 {offsets = [0, 0, 20], sizes = [2, 8, 4], strides = [1, 1, 1]} : vector<2x8x32xf32> to vector<2x8x4xf32>
    %121 = vector.extract_strided_slice %21 {offsets = [0, 0, 20], sizes = [2, 8, 4], strides = [1, 1, 1]} : vector<2x8x32xf32> to vector<2x8x4xf32>
    "tpu.trace_start"() <{level = 10 : i32, message = "bqd,bkd->bqk"}> : () -> ()
    %cst_46 = arith.constant dense<0.000000e+00> : vector<2x16x8xf32>
    %122 = tpu.matmul %119, %120, %cst_46 {dimension_numbers = #tpu.dot_dimension_numbers<[2], [2], [1], [1], [0, 0, 0, 1, 1, 1], [0], [0]>} : vector<2x16x4xf32>, vector<2x8x4xf32>, vector<2x16x8xf32> -> vector<2x16x8xf32>
    "tpu.trace_stop"() : () -> ()
    %cst_47 = arith.constant dense<0xFF800000> : vector<2x16xf32>
    %123 = vector.multi_reduction <maximumf>, %122, %cst_47 [2] : vector<2x16x8xf32> to vector<2x16xf32>
    %124 = vector.shape_cast %123 : vector<2x16xf32> to vector<2x16x1xf32>
    %125 = vector.broadcast %124 : vector<2x16x1xf32> to vector<2x16x8xf32>
    %126 = arith.subf %122, %125 : vector<2x16x8xf32>
    %127 = math.exp %126 : vector<2x16x8xf32>
    %cst_48 = arith.constant dense<0.000000e+00> : vector<2x16xf32>
    %128 = vector.multi_reduction <add>, %127, %cst_48 [2] : vector<2x16x8xf32> to vector<2x16xf32>
    %129 = vector.shape_cast %128 : vector<2x16xf32> to vector<2x16x1xf32>
    %130 = tpu.reciprocal %129 {approx = true} : vector<2x16x1xf32> -> vector<2x16x1xf32>
    %131 = vector.broadcast %130 : vector<2x16x1xf32> to vector<2x16x8xf32>
    %132 = arith.mulf %127, %131 : vector<2x16x8xf32>
    "tpu.trace_start"() <{level = 10 : i32, message = "bqk,bkd->bqd"}> : () -> ()
    %cst_49 = arith.constant dense<0.000000e+00> : vector<2x16x4xf32>
    %133 = tpu.matmul %132, %121, %cst_49 {dimension_numbers = #tpu.dot_dimension_numbers<[2], [1], [1], [2], [0, 0, 0, 1, 1, 2], [0], [0]>} : vector<2x16x8xf32>, vector<2x8x4xf32>, vector<2x16x4xf32> -> vector<2x16x4xf32>
    "tpu.trace_stop"() : () -> ()
    %134 = vector.shape_cast %133 : vector<2x16x4xf32> to vector<32x4xf32>
    %135 = vector.extract_strided_slice %22 {offsets = [20, 0], sizes = [4, 32], strides = [1, 1]} : vector<32x32xf32> to vector<4x32xf32>
    %cst_50 = arith.constant dense<0.000000e+00> : vector<32x32xf32>
    %136 = tpu.matmul %134, %135, %cst_50 {dimension_numbers = #tpu.dot_dimension_numbers<[1], [0], [0], [1], [0, 0, 1, 1], [], []>} : vector<32x4xf32>, vector<4x32xf32>, vector<32x32xf32> -> vector<32x32xf32>
    %137 = arith.addf %118, %136 : vector<32x32xf32>
    %138 = vector.extract_strided_slice %19 {offsets = [0, 0, 24], sizes = [2, 16, 4], strides = [1, 1, 1]} : vector<2x16x32xf32> to vector<2x16x4xf32>
    %139 = vector.extract_strided_slice %20 {offsets = [0, 0, 24], sizes = [2, 8, 4], strides = [1, 1, 1]} : vector<2x8x32xf32> to vector<2x8x4xf32>
    %140 = vector.extract_strided_slice %21 {offsets = [0, 0, 24], sizes = [2, 8, 4], strides = [1, 1, 1]} : vector<2x8x32xf32> to vector<2x8x4xf32>
    "tpu.trace_start"() <{level = 10 : i32, message = "bqd,bkd->bqk"}> : () -> ()
    %cst_51 = arith.constant dense<0.000000e+00> : vector<2x16x8xf32>
    %141 = tpu.matmul %138, %139, %cst_51 {dimension_numbers = #tpu.dot_dimension_numbers<[2], [2], [1], [1], [0, 0, 0, 1, 1, 1], [0], [0]>} : vector<2x16x4xf32>, vector<2x8x4xf32>, vector<2x16x8xf32> -> vector<2x16x8xf32>
    "tpu.trace_stop"() : () -> ()
    %cst_52 = arith.constant dense<0xFF800000> : vector<2x16xf32>
    %142 = vector.multi_reduction <maximumf>, %141, %cst_52 [2] : vector<2x16x8xf32> to vector<2x16xf32>
    %143 = vector.shape_cast %142 : vector<2x16xf32> to vector<2x16x1xf32>
    %144 = vector.broadcast %143 : vector<2x16x1xf32> to vector<2x16x8xf32>
    %145 = arith.subf %141, %144 : vector<2x16x8xf32>
    %146 = math.exp %145 : vector<2x16x8xf32>
    %cst_53 = arith.constant dense<0.000000e+00> : vector<2x16xf32>
    %147 = vector.multi_reduction <add>, %146, %cst_53 [2] : vector<2x16x8xf32> to vector<2x16xf32>
    %148 = vector.shape_cast %147 : vector<2x16xf32> to vector<2x16x1xf32>
    %149 = tpu.reciprocal %148 {approx = true} : vector<2x16x1xf32> -> vector<2x16x1xf32>
    %150 = vector.broadcast %149 : vector<2x16x1xf32> to vector<2x16x8xf32>
    %151 = arith.mulf %146, %150 : vector<2x16x8xf32>
    "tpu.trace_start"() <{level = 10 : i32, message = "bqk,bkd->bqd"}> : () -> ()
    %cst_54 = arith.constant dense<0.000000e+00> : vector<2x16x4xf32>
    %152 = tpu.matmul %151, %140, %cst_54 {dimension_numbers = #tpu.dot_dimension_numbers<[2], [1], [1], [2], [0, 0, 0, 1, 1, 2], [0], [0]>} : vector<2x16x8xf32>, vector<2x8x4xf32>, vector<2x16x4xf32> -> vector<2x16x4xf32>
    "tpu.trace_stop"() : () -> ()
    %153 = vector.shape_cast %152 : vector<2x16x4xf32> to vector<32x4xf32>
    %154 = vector.extract_strided_slice %22 {offsets = [24, 0], sizes = [4, 32], strides = [1, 1]} : vector<32x32xf32> to vector<4x32xf32>
    %cst_55 = arith.constant dense<0.000000e+00> : vector<32x32xf32>
    %155 = tpu.matmul %153, %154, %cst_55 {dimension_numbers = #tpu.dot_dimension_numbers<[1], [0], [0], [1], [0, 0, 1, 1], [], []>} : vector<32x4xf32>, vector<4x32xf32>, vector<32x32xf32> -> vector<32x32xf32>
    %156 = arith.addf %137, %155 : vector<32x32xf32>
    %157 = vector.extract_strided_slice %19 {offsets = [0, 0, 28], sizes = [2, 16, 4], strides = [1, 1, 1]} : vector<2x16x32xf32> to vector<2x16x4xf32>
    %158 = vector.extract_strided_slice %20 {offsets = [0, 0, 28], sizes = [2, 8, 4], strides = [1, 1, 1]} : vector<2x8x32xf32> to vector<2x8x4xf32>
    %159 = vector.extract_strided_slice %21 {offsets = [0, 0, 28], sizes = [2, 8, 4], strides = [1, 1, 1]} : vector<2x8x32xf32> to vector<2x8x4xf32>
    "tpu.trace_start"() <{level = 10 : i32, message = "bqd,bkd->bqk"}> : () -> ()
    %cst_56 = arith.constant dense<0.000000e+00> : vector<2x16x8xf32>
    %160 = tpu.matmul %157, %158, %cst_56 {dimension_numbers = #tpu.dot_dimension_numbers<[2], [2], [1], [1], [0, 0, 0, 1, 1, 1], [0], [0]>} : vector<2x16x4xf32>, vector<2x8x4xf32>, vector<2x16x8xf32> -> vector<2x16x8xf32>
    "tpu.trace_stop"() : () -> ()
    %cst_57 = arith.constant dense<0xFF800000> : vector<2x16xf32>
    %161 = vector.multi_reduction <maximumf>, %160, %cst_57 [2] : vector<2x16x8xf32> to vector<2x16xf32>
    %162 = vector.shape_cast %161 : vector<2x16xf32> to vector<2x16x1xf32>
    %163 = vector.broadcast %162 : vector<2x16x1xf32> to vector<2x16x8xf32>
    %164 = arith.subf %160, %163 : vector<2x16x8xf32>
    %165 = math.exp %164 : vector<2x16x8xf32>
    %cst_58 = arith.constant dense<0.000000e+00> : vector<2x16xf32>
    %166 = vector.multi_reduction <add>, %165, %cst_58 [2] : vector<2x16x8xf32> to vector<2x16xf32>
    %167 = vector.shape_cast %166 : vector<2x16xf32> to vector<2x16x1xf32>
    %168 = tpu.reciprocal %167 {approx = true} : vector<2x16x1xf32> -> vector<2x16x1xf32>
    %169 = vector.broadcast %168 : vector<2x16x1xf32> to vector<2x16x8xf32>
    %170 = arith.mulf %165, %169 : vector<2x16x8xf32>
    "tpu.trace_start"() <{level = 10 : i32, message = "bqk,bkd->bqd"}> : () -> ()
    %cst_59 = arith.constant dense<0.000000e+00> : vector<2x16x4xf32>
    %171 = tpu.matmul %170, %159, %cst_59 {dimension_numbers = #tpu.dot_dimension_numbers<[2], [1], [1], [2], [0, 0, 0, 1, 1, 2], [0], [0]>} : vector<2x16x8xf32>, vector<2x8x4xf32>, vector<2x16x4xf32> -> vector<2x16x4xf32>
    "tpu.trace_stop"() : () -> ()
    %172 = vector.shape_cast %171 : vector<2x16x4xf32> to vector<32x4xf32>
    %173 = vector.extract_strided_slice %22 {offsets = [28, 0], sizes = [4, 32], strides = [1, 1]} : vector<32x32xf32> to vector<4x32xf32>
    %cst_60 = arith.constant dense<0.000000e+00> : vector<32x32xf32>
    %174 = tpu.matmul %172, %173, %cst_60 {dimension_numbers = #tpu.dot_dimension_numbers<[1], [0], [0], [1], [0, 0, 1, 1], [], []>} : vector<32x4xf32>, vector<4x32xf32>, vector<32x32xf32> -> vector<32x32xf32>
    %175 = arith.addf %156, %174 : vector<32x32xf32>
    %c0_61 = arith.constant 0 : index
    %c0_62 = arith.constant 0 : index
    %176 = vector.load %arg10[%c0_61, %c0_62] : memref<1x32xf32, #tpu.memory_space<vmem>>, vector<1x32xf32>
    %177 = vector.broadcast %176 : vector<1x32xf32> to vector<32x32xf32>
    %178 = arith.addf %175, %177 : vector<32x32xf32>
    %c0_63 = arith.constant 0 : index
    %c0_64 = arith.constant 0 : index
    %179 = vector.load %arg11[%c0_63, %c0_64] : memref<32x32xf32, #tpu.memory_space<vmem>>, vector<32x32xf32>
    tpu.vector_store %arg11[%c0_63, %c0_64], %178 {strides = array<i32>} : memref<32x32xf32, #tpu.memory_space<vmem>>, vector<32x32xf32>,
    return
  }
  func.func @transform_0(%arg0: i32) -> (i32, i32) {
    %c0_i32 = arith.constant 0 : i32
    %c0_i32_0 = arith.constant 0 : i32
    return %arg0, %c0_i32 : i32, i32
  }
  func.func @transform_1(%arg0: i32) -> (i32, i32) {
    %c0_i32 = arith.constant 0 : i32
    %c0_i32_0 = arith.constant 0 : i32
    return %arg0, %c0_i32 : i32, i32
  }
  func.func @transform_2(%arg0: i32) -> (i32, i32) {
    %c0_i32 = arith.constant 0 : i32
    %c0_i32_0 = arith.constant 0 : i32
    %c0_i32_1 = arith.constant 0 : i32
    return %c0_i32, %c0_i32_0 : i32, i32
  }
  func.func @transform_3(%arg0: i32) -> (i32, i32) {
    %c0_i32 = arith.constant 0 : i32
    %c0_i32_0 = arith.constant 0 : i32
    %c0_i32_1 = arith.constant 0 : i32
    return %c0_i32, %c0_i32_0 : i32, i32
  }
  func.func @transform_4(%arg0: i32) -> (i32, i32) {
    %c0_i32 = arith.constant 0 : i32
    %c0_i32_0 = arith.constant 0 : i32
    %c0_i32_1 = arith.constant 0 : i32
    return %c0_i32, %c0_i32_0 : i32, i32
  }
  func.func @transform_5(%arg0: i32) -> (i32, i32) {
    %c0_i32 = arith.constant 0 : i32
    %c0_i32_0 = arith.constant 0 : i32
    %c0_i32_1 = arith.constant 0 : i32
    return %c0_i32, %c0_i32_0 : i32, i32
  }
  func.func @transform_6(%arg0: i32) -> (i32, i32) {
    %c0_i32 = arith.constant 0 : i32
    %c0_i32_0 = arith.constant 0 : i32
    %c0_i32_1 = arith.constant 0 : i32
    return %c0_i32, %c0_i32_0 : i32, i32
  }
  func.func @transform_7(%arg0: i32) -> (i32, i32) {
    %c0_i32 = arith.constant 0 : i32
    %c0_i32_0 = arith.constant 0 : i32
    %c0_i32_1 = arith.constant 0 : i32
    return %c0_i32, %c0_i32_0 : i32, i32
  }
  func.func @transform_8(%arg0: i32) -> (i32, i32) {
    %c0_i32 = arith.constant 0 : i32
    %c0_i32_0 = arith.constant 0 : i32
    %c0_i32_1 = arith.constant 0 : i32
    return %c0_i32, %c0_i32_0 : i32, i32
  }
  func.func @transform_9(%arg0: i32) -> (i32, i32) {
    %c0_i32 = arith.constant 0 : i32
    %c0_i32_0 = arith.constant 0 : i32
    %c0_i32_1 = arith.constant 0 : i32
    return %c0_i32, %c0_i32_0 : i32, i32
  }
  func.func @transform_10(%arg0: i32) -> (i32, i32) {
    %c0_i32 = arith.constant 0 : i32
    %c0_i32_0 = arith.constant 0 : i32
    return %arg0, %c0_i32 : i32, i32
  }
}

</mosaic_0001>

<bundles_post_ra>
// kernel: tpu_custom_call.1
= control target key start
LH: loop header
LB: loop body
LE: loop exit
PB: predicated region body
PF: predicated region fallthrough
CT: control target
= control target key end

     0   :  { %15 = vsyncpa [#allocation3], 0  ;;  %s3081_s0 = inlined_call_operand.hbm [shape: f32[32,32], index: 0, kind: input, shape index: {}]   ;;  %s3082_s1 = inlined_call_operand.hbm [shape: f32[16,32], index: 1, kind: input, shape index: {}]   ;;  %s3083_s2 = inlined_call_operand.hbm [shape: f32[32,32], index: 2, kind: input, shape index: {}]   ;;  %s3084_s3 = inlined_call_operand.vmem [shape: f32[1,32], index: 3, kind: input, shape index: {}]   ;;  %s3085_s4 = inlined_call_operand.hbm [shape: f32[32,32], index: 4, kind: input, shape index: {}]   ;;  %s3086_s5 = inlined_call_operand.vmem [shape: f32[1,32], index: 5, kind: input, shape index: {}]   ;;  %s3087_s6 = inlined_call_operand.hbm [shape: f32[32,32], index: 6, kind: input, shape index: {}]   ;;  %s3088_s7 = inlined_call_operand.vmem [shape: f32[1,32], index: 7, kind: input, shape index: {}]   ;;  %s3089_s8 = inlined_call_operand.hbm [shape: f32[32,32], index: 8, kind: input, shape index: {}]   ;;  %s3090_s9 = inlined_call_operand.vmem [shape: f32[1,32], index: 9, kind: input, shape index: {}]   ;;  %s3091_s10 = inlined_call_operand.hbm [shape: f32[32,32], index: 10, kind: output, shape index: {}]  }
   0x1   :  { %16 = vsyncpa [#allocation6], 0 }
   0x2   :  { %17 = vsyncpa [#allocation9], 0 }
   0x3   :  { %18 = vsyncpa [#allocation12], 0 }
   0x4   :  { %19 = vsyncpa [#allocation4], 0  ;;  %s37_s15 = sshll.u32 %s3082_s1, 4  ;;  %s2548_s16 = smov [#allocation5]   ;;  %s38_s15 = int_to_ptr.hbm [resolvable:$true] %s37_s15 }
   0x5   :  { %s39_s17 = sshll.u32 %s2548_s16, 4  ;;  %s65_s20 = sshll.u32 %s3085_s4, 4  ;;  %s40_s17 = int_to_ptr.vmem [resolvable:$true] %s39_s17  ;;  %s66_s20 = int_to_ptr.hbm [resolvable:$true] %s65_s20 }
   0x6   :  { %s2549_s21 = smov 128   ;;  %s2550_s22 = smov 8  }
   0x7   :  { %45 = dma.hbm_to_vmem [thread:$0]  %s38_s15, 256, %s40_s17, [#allocation6], %s2549_s21, %s2549_s21, %s2550_s22  }
   0x8   :  { %s2551_s23 = smov [#allocation8]   ;;  %s24_s1 = sshll.u32 %s3081_s0, 4  ;;  %s25_s1 = int_to_ptr.hbm [resolvable:$true] %s24_s1 }
   0x9   :  { %s67_s24 = sshll.u32 %s2551_s23, 4  ;;  %s50_s28 = sshll.u32 %s3083_s2, 4  ;;  %s68_s24 = int_to_ptr.vmem [resolvable:$true] %s67_s24  ;;  %s51_s28 = int_to_ptr.hbm [resolvable:$true] %s50_s28 }
   0xa   :  { %73 = dma.hbm_to_vmem [thread:$0]  %s66_s20, 512, %s68_s24, [#allocation9], %s2549_s21, %s2549_s21, %s2550_s22  }
   0xb   :  { %s2552_s29 = smov [#allocation2]   ;;  %s2553_s11 = smov [#allocation7]  }
   0xc   :  { %s26_s30 = sshll.u32 %s2552_s29, 4  ;;  %s52_s0 = sshll.u32 %s2553_s11, 4  ;;  %s27_s30 = int_to_ptr.vmem [resolvable:$true] %s26_s30  ;;  %s53_s0 = int_to_ptr.vmem [resolvable:$true] %s52_s0 }
   0xd   :  { %32 = dma.hbm_to_vmem [thread:$0]  %s25_s1, 512, %s27_s30, [#allocation3], %s2549_s21, %s2549_s21, %s2550_s22  }
   0xe   :  { %s80_s14 = sshll.u32 %s3087_s6, 4  ;;  %s95_s16 = sshll.u32 %s3089_s8, 4  ;;  %s81_s14 = int_to_ptr.hbm [resolvable:$true] %s80_s14  ;;  %s96_s16 = int_to_ptr.hbm [resolvable:$true] %s95_s16 }
   0xf   :  { %58 = dma.hbm_to_vmem [thread:$0]  %s51_s28, 512, %s53_s0, [#allocation6], %s2549_s21, %s2549_s21, %s2550_s22  }
  0x10   :  { %s2554_s17 = smov [#allocation10]   ;;  %s2555_s19 = smov [#allocation11]  }
  0x11   :  { %s82_s18 = sshll.u32 %s2554_s17, 4  ;;  %s97_s6 = sshll.u32 %s2555_s19, 4  ;;  %s83_s18 = int_to_ptr.vmem [resolvable:$true] %s82_s18  ;;  %s98_s6 = int_to_ptr.vmem [resolvable:$true] %s97_s6 }
  0x12   :  { %88 = dma.hbm_to_vmem [thread:$0]  %s81_s14, 512, %s83_s18, [#allocation9], %s2549_s21, %s2549_s21, %s2550_s22  }
  0x13   :  { %103 = dma.hbm_to_vmem [thread:$0]  %s96_s16, 512, %s98_s6, [#allocation12], %s2549_s21, %s2549_s21, %s2550_s22  }
  0x14   :  { %2538 = dma.done.wait [#allocation3], 512  }
  0x15   :  { %2539 = vsyncadd [#allocation3], 4294966784 }
  0x16   :  { %2540 = dma.done.wait [#allocation6], 768  }
  0x17   :  { %2541 = vsyncadd [#allocation6], 4294966528 }
  0x18   :  { %2542 = dma.done.wait [#allocation9], 1024  }
  0x19   :  { %2543 = vsyncadd [#allocation9], 4294966272 }
  0x1a   :  { %2544 = dma.done.wait [#allocation12], 512  }
  0x1b   :  { %2545 = vsyncadd [#allocation12], 4294966784  ;;  %v139_v0 = vld [vmem:[#allocation7 + $0x18] sm:$0xff]  ;;  %v138_v2 = vld [vmem:[#allocation7 + $0x10] sm:$0xff]  ;;  %vm144_vm0 = vcmask 261120   ;;  %vm262_vm1 = vcmask 31744  }
  0x1c   :  { %v193_v1 = vld [vmem:[#allocation8 + $0x18] sm:$0xff]  ;;  %169 = vmatpush.msra.mxu0 %v139_v0  ;;  %v192_v3 = vld [vmem:[#allocation8 + $0x10] sm:$0xff]  ;;  %v137_v4 = vld [vmem:[#allocation7 + $0x8] sm:$0xff]  ;;  %s2556_s25 = smov 124   ;;  %vm327_vm2 = vcmask 64512   ;;  %s2558_s26 = smov 116  }
  0x1d   :  { %216 = vmatpush.msra.mxu2 %v193_v1  ;;  %v191_v5 = vld [vmem:[#allocation8 + $0x8] sm:$0xff]  ;;  %v136_v6 = vld [vmem:[#allocation7] sm:$0xff]  ;;  %v130_v8 = vld [vmem:[#allocation2] sm:$0xff]  ;;  %vm624_vm3 = vcmask 1043456   ;;  %s2559_s1 = smov 112   ;;  %s2560_s4 = smov 108  }
  0x1e   :  { %170 = vmatpush.msra.mxu0 %v138_v2  ;;  %v190_v7 = vld [vmem:[#allocation8] sm:$0xff]  ;;  %v2655_v9 = vld [vmem:[#allocation5] sm:$0xff]  ;;  %v131_v10 = vld [vmem:[#allocation2 + $0x8] sm:$0xff]  ;;  %s2561_s27 = smov 104   ;;  %s2562_s28 = smov 100  }
  0x1f   :  { %217 = vmatpush.msra.mxu2 %v192_v3  ;;  %v2660_v11 = vld [vmem:[#allocation5 + $0x8] sm:$0xff]  ;;  %v132_v12 = vld [vmem:[#allocation2 + $0x10] sm:$0xff]  ;;  %v133_v13 = vld [vmem:[#allocation2 + $0x18] sm:$0xff]  ;;  %s2073_s13 = sshll.u32 %s3091_s10, 4  ;;  %s2074_s13 = int_to_ptr.hbm [resolvable:$true] %s2073_s13 }
  0x20   :  { %171 = vmatpush.msra.mxu0 %v137_v4  ;;  %v2238_v14 = vld [vmem:[%s3084_s3] ss:$0 sm:$0xff]  ;;  %v230_v36 = vld [vmem:[#allocation10 + $0x18] sm:$0xff]  ;;  %v228_v40 = vld [vmem:[#allocation10 + $0x8] sm:$0xff] }
  0x21   :  { %218 = vmatpush.msra.mxu2 %v191_v5  ;;  %v2239_v16 = vld [vmem:[%s3086_s5] ss:$0 sm:$0xff]  ;;  %v227_v41 = vld [vmem:[#allocation10] sm:$0xff] }
  0x22   :  { %172 = vmatpush.msra.mxu0 %v136_v6  ;;  %v229_v37 = vld [vmem:[#allocation10 + $0x10] sm:$0xff] }
  0x23   :  { %219 = vmatpush.msra.mxu2 %v190_v7  ;;  %2089 = vmatmul.msk.f32.vlgmr.msra.gmra.mxu0 %vm144_vm0, %v130_v8  ;;  %v2240_v59 = vld [vmem:[%s3088_s7] ss:$0 sm:$0xff]  ;;  %s2557_s7 = smov 120  }
  0x24   :  { %2093 = vmatmul.msk.f32.vlgmr.msra.gmra.mxu2 %vm144_vm0, %v2655_v9 }
  0x25   :  { %247 = vmatpush.msrb.mxu2 %v230_v36 }
  0x27   :  { %248 = vmatpush.msrb.mxu2 %v229_v37 }
  0x29   :  { %249 = vmatpush.msrb.mxu2 %v228_v40 }
  0x2b   :  { %2090 = vmatmul.msk.f32.gmra.mxu0 %vm144_vm0, %v131_v10  ;;  %250 = vmatpush.msrb.mxu2 %v227_v41 }
  0x2c   :  { %2094 = vmatmul.msk.f32.gmra.mxu2 %vm144_vm0, %v2660_v11 }
  0x33   :  { %2091 = vmatmul.msk.f32.gmra.mxu0 %vm144_vm0, %v132_v12 }
  0x34   :  { %2095 = vmatmul.msk.f32.vlgmr.msrb.gmra.mxu2 %vm144_vm0, %v2655_v9 }
  0x3b   :  { %2092 = vmatmul.msk.f32.gmra.mxu0 %vm144_vm0, %v133_v13 }
  0x3c   :  { %2096 = vmatmul.msk.f32.gmra.mxu2 %vm144_vm0, %v2660_v11 }
  0xa0   :  { %v174_v15 = vpop.f32.mrf.mxu0 }
  0xa1   :  { %v175_v17 = vadd.f32 %v2238_v14, %v174_v15 }
  0xa3   :  { %v2675_v20 = vmul.f32 0.5, %v175_v17 }
  0xa7   :  { %v221_v18 = vpop.f32.mrf.mxu2 }
  0xa8   :  { %v2673_v19 = vadd.f32 %v2239_v16, %v221_v18  ;;  %v177_v21 = vpop.f32.mrf.mxu0 }
  0xa9   :  { %v178_v22 = vadd.f32 %v2238_v14, %v177_v21 }
  0xaa   :  { %434 = vrot.lane.b32.xlu1 %v2673_v19, %s2556_s25  ;;  %2097 = vmatpush.xpose.msk.msra.mxu3 %vm262_vm1, %v2673_v19 }
  0xab   :  { %v2685_v25 = vmul.f32 0.5, %v178_v22 }
  0xad   :  { %2098 = vmatmul.msk.f32.vlgmr.msra.gmra.mxu3 %vm262_vm1, %v2675_v20 }
  0xaf   :  { %v224_v23 = vpop.f32.mrf.mxu2 }
  0xb0   :  { %v2683_v24 = vadd.f32 %v2239_v16, %v224_v23  ;;  %v180_v26 = vpop.f32.mrf.mxu0 }
  0xb1   :  { %v181_v27 = vadd.f32 %v2238_v14, %v180_v26 }
  0xb2   :  { %469 = vrot.lane.b32.xlu0 %v2683_v24, %s2556_s25  ;;  %430 = vrot.lane.b32.xlu1 %v2675_v20, %s2556_s25 }
  0xb3   :  { %2100 = vmatpush.xpose.msk.msrb.mxu3 %vm262_vm1, %v2683_v24  ;;  %v2695_v28 = vmul.f32 0.5, %v181_v27 }
  0xb5   :  { %2099 = vmatmul.msk.f32.gmra.mxu3 %vm262_vm1, %v2685_v25 }
  0xb7   :  { %v252_v61 = vpop.f32.mrf.mxu2 }
  0xb8   :  { %v183_v29 = vpop.f32.mrf.mxu0  ;;  %v2727_v62 = vadd.f32 %v2240_v59, %v252_v61 }
  0xb9   :  { %v184_v30 = vadd.f32 %v2238_v14, %v183_v29 }
  0xba   :  { %465 = vrot.lane.b32.xlu0 %v2695_v28, %s2556_s25  ;;  %393 = vmatpush.msra.mxu1 %v2727_v62 }
  0xbb   :  { %v2699_v31 = vmul.f32 0.5, %v184_v30 }
  0xbd   :  { %2101 = vmatmul.msk.f32.vlgmr.msrb.gmra.mxu3 %vm262_vm1, %v2695_v28  ;;  %467 = vrot.lane.b32.xlu2 %v2699_v31, %s2556_s25 }
  0xbf   :  { %v255_v6 = vpop.f32.mrf.mxu2 }
  0xc0   :  { %v2735_v7 = vadd.f32 %v2240_v59, %v255_v6 }
  0xc2   :  { %422 = vmatpush.msra.mxu2 %v2735_v7 }
  0xc5   :  { %2102 = vmatmul.msk.f32.gmra.mxu3 %vm262_vm1, %v2699_v31  ;;  %432 = vrot.lane.b32.xlu2 %v2685_v25, %s2556_s25 }
 0x117   :  { %v468_v33 = vpop.permute.xlu2 %467 }
 0x11c   :  { %v435_v32 = vpop.permute.xlu1 %434 }
 0x11d   :  { %2107 = vmatpush.xpose.msk.msra.mxu3 %vm262_vm1, %v435_v32 }
 0x11f   :  { %v433_v38 = vpop.permute.xlu2 %432 }
 0x124   :  { %v470_v34 = vpop.permute.xlu0 %469  ;;  %v431_v35 = vpop.permute.xlu1 %430 }
 0x125   :  { %2108 = vmatmul.msk.f32.vlgmr.msra.gmra.mxu3 %vm262_vm1, %v431_v35  ;;  %2110 = vmatpush.xpose.msk.msrb.mxu0 %vm262_vm1, %v470_v34 }
 0x12c   :  { %v466_v39 = vpop.permute.xlu0 %465 }
 0x12d   :  { %2109 = vmatmul.msk.f32.gmra.mxu3 %vm262_vm1, %v433_v38  ;;  %2111 = vmatmul.msk.f32.vlgmr.msrb.gmra.mxu0 %vm262_vm1, %v466_v39 }
 0x130   :  { %v289_v42 = vpop.f32.mrf.mxu3 }
 0x131   :  { %v328_v43 = vsel %vm327_vm2, %v289_v42, -inf }
 0x132   :  { %329 = vmax.xlane.f32.xlu0 %v328_v43 }
 0x135   :  { %2112 = vmatmul.msk.f32.gmra.mxu0 %vm262_vm1, %v468_v33 }
 0x138   :  { %v292_v44 = vpop.f32.mrf.mxu3 }
 0x139   :  { %v331_v45 = vsel %vm327_vm2, %v292_v44, -inf }
 0x13a   :  { %332 = vmax.xlane.f32.xlu1 %v331_v45 }
 0x140   :  { %v321_v46 = vpop.f32.mrf.mxu3 }
 0x141   :  { %v334_v47 = vsel %vm327_vm2, %v321_v46, -inf }
 0x142   :  { %335 = vmax.xlane.f32.xlu2 %v334_v47 }
 0x148   :  { %v324_v48 = vpop.f32.mrf.mxu3 }
 0x149   :  { %v337_v49 = vsel %vm327_vm2, %v324_v48, -inf }
 0x14a   :  { %338 = vmax.xlane.f32.xlu2 %v337_v49 }
 0x1a5   :  { %v330_v50 = vpop.xlane.xlu0 %329 }
 0x1a6   :  { %v340_v51 = vsub.f32 %v289_v42, %v330_v50 }
 0x1a8   :  { %v344_v52 = vmul.f32 1.442695, %v340_v51  ;;  %v2731_v2 = vpop.f32.mrf.mxu3 }
 0x1a9   :  { %v500_v18 = vsel %vm327_vm2, %v2731_v2, -inf }
 0x1aa   :  { %2242 = vpow2.f32 %v344_v52  ;;  %v2733_v3 = vpop.f32.mrf.mxu0 }
 0x1ab   :  { %v506_v10 = vsel %vm327_vm2, %v2733_v3, -inf }
 0x1ad   :  { %v333_v53 = vpop.xlane.xlu1 %332 }
 0x1ae   :  { %v341_v54 = vsub.f32 %v292_v44, %v333_v53 }
 0x1b0   :  { %v2243_v55 = vpop.eup %2242  ;;  %v346_v56 = vmul.f32 1.442695, %v341_v54  ;;  %v462_v12 = vpop.f32.mrf.mxu3 }
 0x1b1   :  { %v352_v57 = vsel %vm327_vm2, %v2243_v55, 0.0  ;;  %v503_v15 = vsel %vm327_vm2, %v462_v12, -inf }
 0x1b2   :  { %2244 = vpow2.f32 %v346_v56  ;;  %353 = vadd.xlane.f32.xlu0 %v352_v57  ;;  %v497_v13 = vpop.f32.mrf.mxu0 }
 0x1b3   :  { %v509_v16 = vsel %vm327_vm2, %v497_v13, -inf }
 0x1b5   :  { %v336_v58 = vpop.xlane.xlu2 %335 }
 0x1b6   :  { %v342_v60 = vsub.f32 %v321_v46, %v336_v58  ;;  %v258_v46 = vld [vmem:[#allocation11] sm:$0xff] }
 0x1b7   :  { %2122 = vmatpush.msk.msra.mxu0 %vm624_vm3, %v258_v46 }
 0x1b8   :  { %v2245_v63 = vpop.eup %2244  ;;  %v348_v0 = vmul.f32 1.442695, %v342_v60 }
 0x1b9   :  { %v355_v1 = vsel %vm327_vm2, %v2245_v63, 0.0 }
 0x1ba   :  { %2246 = vpow2.f32 %v348_v0  ;;  %356 = vadd.xlane.f32.xlu1 %v355_v1 }
 0x1bd   :  { %v339_v4 = vpop.xlane.xlu2 %338 }
 0x1be   :  { %v343_v5 = vsub.f32 %v324_v48, %v339_v4  ;;  %v611_v48 = vrot.slane %v258_v46, 4 }
 0x1c0   :  { %v2247_v8 = vpop.eup %2246  ;;  %v350_v9 = vmul.f32 1.442695, %v343_v5  ;;  %2117 = vmatpush.msk.msrb.mxu3 %vm624_vm3, %v611_v48 }
 0x1c1   :  { %v358_v11 = vsel %vm327_vm2, %v2247_v8, 0.0 }
 0x1c2   :  { %2248 = vpow2.f32 %v350_v9  ;;  %507 = vmax.xlane.f32.xlu1 %v506_v10  ;;  %359 = vadd.xlane.f32.xlu2 %v358_v11 }
 0x1c8   :  { %v2249_v14 = vpop.eup %2248 }
 0x1c9   :  { %v361_v17 = vsel %vm327_vm2, %v2249_v14, 0.0 }
 0x1ca   :  { %504 = vmax.xlane.f32.xlu1 %v503_v15  ;;  %510 = vmax.xlane.f32.xlu2 %v509_v16 }
 0x1cb   :  { %362 = vadd.xlane.f32.xlu0 %v361_v17 }
 0x1d3   :  { %501 = vmax.xlane.f32.xlu0 %v500_v18 }
 0x1e2   :  { %545 = vrot.lane.b32.xlu2 %v2727_v62, %s2556_s25 }
 0x1e3   :  { %578 = vrot.lane.b32.xlu1 %v2735_v7, %s2556_s25 }
 0x1e7   :  { %738 = vrot.lane.b32.xlu0 %v2683_v24, %s2557_s7 }
 0x1eb   :  { %734 = vrot.lane.b32.xlu1 %v2695_v28, %s2557_s7 }
 0x1ef   :  { %703 = vrot.lane.b32.xlu0 %v2673_v19, %s2557_s7 }
 0x1f3   :  { %736 = vrot.lane.b32.xlu1 %v2699_v31, %s2557_s7 }
 0x1fb   :  { %929 = vrot.lane.b32.xlu1 %v2673_v19, %s2558_s26 }
 0x203   :  { %927 = vrot.lane.b32.xlu1 %v2685_v25, %s2558_s26 }
 0x225   :  { %v354_v21 = vpop.xlane.xlu0 %353 }
 0x226   :  { %2250 = vrcp.f32 %v354_v21 }
 0x22c   :  { %v2251_v22 = vpop.eup %2250 }
 0x22d   :  { %v357_v23 = vpop.xlane.xlu1 %356  ;;  %v368_v26 = vmul.f32 %v2251_v22, %v2243_v55 }
 0x22e   :  { %2252 = vrcp.f32 %v357_v23 }
 0x22f   :  { %2103 = vmatmul.msk.f32.vlgmr.msra.gmra.mxu1 %vm327_vm2, %v368_v26 }
 0x234   :  { %v2253_v27 = vpop.eup %2252 }
 0x235   :  { %v508_v29 = vpop.xlane.xlu1 %507  ;;  %v360_v30 = vpop.xlane.xlu2 %359  ;;  %v369_v32 = vmul.f32 %v2253_v27, %v2245_v63 }
 0x236   :  { %2254 = vrcp.f32 %v360_v30  ;;  %v514_v50 = vsub.f32 %v2733_v3, %v508_v29 }
 0x237   :  { %2104 = vmatmul.msk.f32.gmra.mxu1 %vm327_vm2, %v369_v32 }
 0x238   :  { %v520_v53 = vmul.f32 1.442695, %v514_v50 }
 0x23c   :  { %v2255_v33 = vpop.eup %2254 }
 0x23d   :  { %v370_v34 = vmul.f32 %v2255_v33, %v2247_v8  ;;  %v505_v35 = vpop.xlane.xlu1 %504  ;;  %v511_v36 = vpop.xlane.xlu2 %510 }
 0x23e   :  { %v513_v37 = vsub.f32 %v462_v12, %v505_v35  ;;  %v363_v38 = vpop.xlane.xlu0 %362  ;;  %v515_v40 = vsub.f32 %v497_v13, %v511_v36 }
 0x23f   :  { %2256 = vrcp.f32 %v363_v38  ;;  %2105 = vmatmul.msk.f32.vlgmr.msra.gmra.mxu2 %vm327_vm2, %v370_v34 }
 0x240   :  { %v518_v39 = vmul.f32 1.442695, %v513_v37  ;;  %v522_v41 = vmul.f32 1.442695, %v515_v40 }
 0x242   :  { %2258 = vpow2.f32 %v518_v39 }
 0x243   :  { %2260 = vpow2.f32 %v522_v41 }
 0x245   :  { %v2257_v42 = vpop.eup %2256  ;;  %v546_v43 = vpop.permute.xlu2 %545 }
 0x246   :  { %v502_v44 = vpop.xlane.xlu0 %501  ;;  %v371_v45 = vmul.f32 %v2257_v42, %v2249_v14  ;;  %569 = vmatpush.msrb.mxu1 %v546_v43 }
 0x247   :  { %v512_v47 = vsub.f32 %v2731_v2, %v502_v44  ;;  %v2233_v2 = vpack.i.bf16 %v2727_v62, %v2735_v7 }
 0x248   :  { %v2259_v49 = vpop.eup %2258  ;;  %2106 = vmatmul.msk.f32.gmra.mxu2 %vm327_vm2, %v371_v45 }
 0x249   :  { %v516_v51 = vmul.f32 1.442695, %v512_v47  ;;  %v527_v52 = vsel %vm327_vm2, %v2259_v49, 0.0  ;;  %v2261_v54 = vpop.eup %2260 }
 0x24a   :  { %528 = vadd.xlane.f32.xlu0 %v527_v52  ;;  %v533_v56 = vsel %vm327_vm2, %v2261_v54, 0.0 }
 0x24b   :  { %2262 = vpow2.f32 %v516_v51 }
 0x24c   :  { %2264 = vpow2.f32 %v520_v53 }
 0x251   :  { %v2263_v55 = vpop.eup %2262 }
 0x252   :  { %v524_v57 = vsel %vm327_vm2, %v2263_v55, 0.0  ;;  %534 = vadd.xlane.f32.xlu0 %v533_v56  ;;  %v2265_v59 = vpop.eup %2264 }
 0x253   :  { %525 = vadd.xlane.f32.xlu2 %v524_v57  ;;  %v530_v61 = vsel %vm327_vm2, %v2265_v59, 0.0 }
 0x255   :  { %v579_v58 = vpop.permute.xlu1 %578 }
 0x256   :  { %602 = vmatpush.msrb.mxu2 %v579_v58 }
 0x259   :  { %v739_v60 = vpop.permute.xlu0 %738 }
 0x25a   :  { %2130 = vmatpush.xpose.msk.msra.mxu2 %vm262_vm1, %v739_v60 }
 0x25b   :  { %531 = vadd.xlane.f32.xlu2 %v530_v61 }
 0x25d   :  { %v735_v63 = vpop.permute.xlu1 %734 }
 0x261   :  { %v704_v0 = vpop.permute.xlu0 %703 }
 0x262   :  { %2127 = vmatpush.xpose.msk.msra.mxu1 %vm262_vm1, %v704_v0 }
 0x265   :  { %v737_v1 = vpop.permute.xlu1 %736 }
 0x266   :  { %701 = vrot.lane.b32.xlu0 %v2685_v25, %s2557_s7 }
 0x26d   :  { %v930_v3 = vpop.permute.xlu1 %929 }
 0x26e   :  { %2142 = vmatpush.xpose.msk.msrb.mxu0 %vm262_vm1, %v930_v3  ;;  %2234 = vrot.lane.b32.xlu0 %v2233_v2, %s2557_s7 }
 0x273   :  { %699 = vrot.lane.b32.xlu2 %v2675_v20, %s2557_s7 }
 0x275   :  { %v928_v33 = vpop.permute.xlu1 %927 }
 0x27b   :  { %925 = vrot.lane.b32.xlu2 %v2675_v20, %s2558_s26 }
 0x2ac   :  { %v395_v4 = vpop.f32.mrf.mxu1 }
 0x2ad   :  { %2123 = vmatmul.msk.f32.vlgmr.msra.gmra.mxu0 %vm262_vm1, %v395_v4 }
 0x2b4   :  { %v398_v5 = vpop.f32.mrf.mxu1 }
 0x2b5   :  { %2124 = vmatmul.msk.f32.gmra.mxu0 %vm262_vm1, %v398_v5 }
 0x2bd   :  { %v529_v8 = vpop.xlane.xlu0 %528 }
 0x2c2   :  { %v424_v6 = vpop.f32.mrf.mxu2 }
 0x2c3   :  { %2125 = vmatmul.msk.f32.gmra.mxu0 %vm262_vm1, %v424_v6 }
 0x2c5   :  { %v535_v14 = vpop.xlane.xlu0 %534 }
 0x2c6   :  { %v526_v9 = vpop.xlane.xlu2 %525 }
 0x2c7   :  { %2266 = vrcp.f32 %v526_v9 }
 0x2c8   :  { %2268 = vrcp.f32 %v529_v8 }
 0x2cb   :  { %v427_v10 = vpop.f32.mrf.mxu2 }
 0x2cc   :  { %2126 = vmatmul.msk.f32.gmra.mxu0 %vm262_vm1, %v427_v10 }
 0x2cd   :  { %v2267_v11 = vpop.eup %2266 }
 0x2ce   :  { %v532_v12 = vpop.xlane.xlu2 %531  ;;  %v540_v13 = vmul.f32 %v2267_v11, %v2263_v55  ;;  %v2269_v15 = vpop.eup %2268 }
 0x2cf   :  { %2270 = vrcp.f32 %v532_v12  ;;  %v541_v21 = vmul.f32 %v2269_v15, %v2259_v49 }
 0x2d0   :  { %2113 = vmatmul.msk.f32.vlgmr.msrb.gmra.mxu1 %vm327_vm2, %v540_v13  ;;  %2272 = vrcp.f32 %v535_v14 }
 0x2d5   :  { %v2271_v16 = vpop.eup %2270 }
 0x2d6   :  { %v542_v17 = vmul.f32 %v2271_v16, %v2265_v59  ;;  %v700_v18 = vpop.permute.xlu2 %699  ;;  %v2273_v23 = vpop.eup %2272 }
 0x2d7   :  { %v543_v27 = vmul.f32 %v2273_v23, %v2261_v54 }
 0x2d8   :  { %2114 = vmatmul.msk.f32.gmra.mxu1 %vm327_vm2, %v541_v21  ;;  %2115 = vmatmul.msk.f32.vlgmr.msrb.gmra.mxu2 %vm327_vm2, %v542_v17  ;;  %v702_v22 = vpop.permute.xlu0 %701 }
 0x2de   :  { %v926_v26 = vpop.permute.xlu2 %925 }
 0x2df   :  { %2143 = vmatmul.msk.f32.vlgmr.msrb.gmra.mxu0 %vm262_vm1, %v926_v26 }
 0x2e0   :  { %2116 = vmatmul.msk.f32.gmra.mxu2 %vm327_vm2, %v543_v27  ;;  %2128 = vmatmul.msk.f32.vlgmr.msra.gmra.mxu1 %vm262_vm1, %v700_v18  ;;  %v2235_v29 = vpop.permute.xlu0 %2234 }
 0x2e1   :  { %v2237_v30 = vunpack.i.h.bf16 %v2235_v29  ;;  %v2236_v32 = vunpack.i.l.bf16 %v2235_v29 }
 0x2e3   :  { %837 = vmatpush.msrb.mxu1 %v2237_v30  ;;  %869 = vmatpush.msrb.mxu2 %v2236_v32 }
 0x2e7   :  { %2144 = vmatmul.msk.f32.gmra.mxu0 %vm262_vm1, %v928_v33 }
 0x2e8   :  { %2129 = vmatmul.msk.f32.gmra.mxu1 %vm262_vm1, %v702_v22  ;;  %2131 = vmatmul.msk.f32.vlgmr.msra.gmra.mxu2 %vm262_vm1, %v735_v63 }
 0x2f0   :  { %2132 = vmatmul.msk.f32.gmra.mxu2 %vm262_vm1, %v737_v1 }
 0x32a   :  { %v2800_v34 = vpop.f32.mrf.mxu0 }
 0x332   :  { %v2802_v35 = vpop.f32.mrf.mxu0 }
 0x340   :  { %v2805_v37 = vpop.f32.mrf.mxu0 }
 0x349   :  { %v2808_v39 = vpop.f32.mrf.mxu0 }
 0x34d   :  { %v571_v36 = vpop.f32.mrf.mxu1 }
 0x34e   :  { %2118 = vmatmul.msk.f32.vlgmr.msrb.gmra.mxu3 %vm262_vm1, %v571_v36 }
 0x355   :  { %v574_v38 = vpop.f32.mrf.mxu1 }
 0x356   :  { %2119 = vmatmul.msk.f32.gmra.mxu3 %vm262_vm1, %v574_v38 }
 0x35b   :  { %v604_v40 = vpop.f32.mrf.mxu2 }
 0x35c   :  { %v954_v43 = vpop.f32.mrf.mxu0 }
 0x35d   :  { %v728_v41 = vpop.f32.mrf.mxu1  ;;  %v995_v47 = vsel %vm327_vm2, %v954_v43, -inf }
 0x35e   :  { %2120 = vmatmul.msk.f32.gmra.mxu3 %vm262_vm1, %v604_v40  ;;  %v769_v42 = vsel %vm327_vm2, %v728_v41, -inf }
 0x35f   :  { %770 = vmax.xlane.f32.xlu2 %v769_v42 }
 0x363   :  { %v607_v44 = vpop.f32.mrf.mxu2 }
 0x364   :  { %v957_v52 = vpop.f32.mrf.mxu0 }
 0x365   :  { %v731_v45 = vpop.f32.mrf.mxu1  ;;  %v998_v53 = vsel %vm327_vm2, %v957_v52, -inf }
 0x366   :  { %2121 = vmatmul.msk.f32.gmra.mxu3 %vm262_vm1, %v607_v44  ;;  %v772_v46 = vsel %vm327_vm2, %v731_v45, -inf }
 0x367   :  { %773 = vmax.xlane.f32.xlu0 %v772_v46  ;;  %996 = vmax.xlane.f32.xlu2 %v995_v47 }
 0x36b   :  { %v763_v48 = vpop.f32.mrf.mxu2 }
 0x36c   :  { %v775_v49 = vsel %vm327_vm2, %v763_v48, -inf }
 0x36f   :  { %776 = vmax.xlane.f32.xlu0 %v775_v49 }
 0x373   :  { %v766_v50 = vpop.f32.mrf.mxu2 }
 0x374   :  { %v778_v51 = vsel %vm327_vm2, %v766_v50, -inf }
 0x375   :  { %779 = vmax.xlane.f32.xlu1 %v778_v51 }
 0x37d   :  { %999 = vmax.xlane.f32.xlu1 %v998_v53 }
 0x37f   :  { %964 = vrot.lane.b32.xlu2 %v2683_v24, %s2558_s26 }
 0x383   :  { %960 = vrot.lane.b32.xlu0 %v2695_v28, %s2558_s26 }
 0x38b   :  { %1155 = vrot.lane.b32.xlu0 %v2673_v19, %s2559_s1 }
 0x396   :  { %1039 = vrot.lane.b32.xlu1 %v2727_v62, %s2558_s26 }
 0x3d2   :  { %v771_v54 = vpop.xlane.xlu2 %770 }
 0x3d3   :  { %v781_v55 = vsub.f32 %v728_v41, %v771_v54 }
 0x3d5   :  { %v785_v56 = vmul.f32 1.442695, %v781_v55 }
 0x3d7   :  { %2274 = vpow2.f32 %v785_v56 }
 0x3da   :  { %v774_v57 = vpop.xlane.xlu0 %773  ;;  %v997_v58 = vpop.xlane.xlu2 %996 }
 0x3db   :  { %v782_v59 = vsub.f32 %v731_v45, %v774_v57  ;;  %v1007_v9 = vsub.f32 %v954_v43, %v997_v58  ;;  %v259_v57 = vld [vmem:[#allocation11 + $0x8] sm:$0xff] }
 0x3dc   :  { %2137 = vmatpush.msk.msra.mxu3 %vm624_vm3, %v259_v57  ;;  %v1103_v58 = vrot.slane %v259_v57, 4 }
 0x3dd   :  { %v2275_v60 = vpop.eup %2274  ;;  %v787_v61 = vmul.f32 1.442695, %v782_v59  ;;  %v1011_v13 = vmul.f32 1.442695, %v1007_v9 }
 0x3de   :  { %v793_v63 = vsel %vm327_vm2, %v2275_v60, 0.0 }
 0x3df   :  { %2276 = vpow2.f32 %v787_v61  ;;  %794 = vadd.xlane.f32.xlu2 %v793_v63 }
 0x3e2   :  { %v777_v0 = vpop.xlane.xlu0 %776  ;;  %v965_v1 = vpop.permute.xlu2 %964 }
 0x3e3   :  { %v783_v2 = vsub.f32 %v763_v48, %v777_v0  ;;  %2145 = vmatpush.xpose.msk.msra.mxu1 %vm262_vm1, %v965_v1 }
 0x3e5   :  { %v2277_v3 = vpop.eup %2276  ;;  %v789_v4 = vmul.f32 1.442695, %v783_v2 }
 0x3e6   :  { %v796_v5 = vsel %vm327_vm2, %v2277_v3, 0.0 }
 0x3e7   :  { %2278 = vpow2.f32 %v789_v4  ;;  %797 = vadd.xlane.f32.xlu2 %v796_v5 }
 0x3e8   :  { %v780_v6 = vpop.xlane.xlu1 %779 }
 0x3e9   :  { %v784_v8 = vsub.f32 %v766_v50, %v780_v6 }
 0x3eb   :  { %v791_v10 = vmul.f32 1.442695, %v784_v8 }
 0x3ed   :  { %v2279_v11 = vpop.eup %2278  ;;  %2280 = vpow2.f32 %v791_v10 }
 0x3ee   :  { %v799_v12 = vsel %vm327_vm2, %v2279_v11, 0.0  ;;  %2282 = vpow2.f32 %v1011_v13 }
 0x3ef   :  { %800 = vadd.xlane.f32.xlu0 %v799_v12 }
 0x3f0   :  { %v1000_v14 = vpop.xlane.xlu1 %999 }
 0x3f1   :  { %v1008_v15 = vsub.f32 %v957_v52, %v1000_v14 }
 0x3f3   :  { %v2281_v16 = vpop.eup %2280  ;;  %v1013_v17 = vmul.f32 1.442695, %v1008_v15 }
 0x3f4   :  { %v802_v18 = vsel %vm327_vm2, %v2281_v16, 0.0  ;;  %v2283_v21 = vpop.eup %2282 }
 0x3f5   :  { %2284 = vpow2.f32 %v1013_v17  ;;  %803 = vadd.xlane.f32.xlu1 %v802_v18  ;;  %v1019_v26 = vsel %vm327_vm2, %v2283_v21, 0.0  ;;  %v961_v29 = vpop.permute.xlu0 %960 }
 0x3fb   :  { %v2285_v22 = vpop.eup %2284 }
 0x3fc   :  { %v1022_v23 = vsel %vm327_vm2, %v2285_v22, 0.0 }
 0x3fd   :  { %1023 = vadd.xlane.f32.xlu2 %v1022_v23  ;;  %1020 = vadd.xlane.f32.xlu1 %v1019_v26  ;;  %v1156_v33 = vpop.permute.xlu0 %1155 }
 0x403   :  { %962 = vrot.lane.b32.xlu0 %v2699_v31, %s2558_s26 }
 0x408   :  { %v1040_v27 = vpop.permute.xlu1 %1039 }
 0x409   :  { %1063 = vmatpush.msra.mxu2 %v1040_v27 }
 0x415   :  { %1153 = vrot.lane.b32.xlu2 %v2685_v25, %s2559_s1 }
 0x416   :  { %1151 = vrot.lane.b32.xlu1 %v2675_v20, %s2559_s1 }
 0x452   :  { %v795_v30 = vpop.xlane.xlu2 %794 }
 0x453   :  { %2286 = vrcp.f32 %v795_v30 }
 0x459   :  { %v2287_v32 = vpop.eup %2286 }
 0x45a   :  { %v809_v36 = vmul.f32 %v2287_v32, %v2275_v60  ;;  %v798_v38 = vpop.xlane.xlu2 %797 }
 0x45b   :  { %2288 = vrcp.f32 %v798_v38 }
 0x45c   :  { %2133 = vmatmul.msk.f32.vlgmr.msrb.gmra.mxu1 %vm327_vm2, %v809_v36 }
 0x45d   :  { %2152 = vmatpush.msk.msrb.mxu1 %vm624_vm3, %v1103_v58 }
 0x461   :  { %v2289_v40 = vpop.eup %2288 }
 0x462   :  { %v801_v41 = vpop.xlane.xlu0 %800  ;;  %v810_v42 = vmul.f32 %v2289_v40, %v2277_v3 }
 0x463   :  { %2290 = vrcp.f32 %v801_v41 }
 0x464   :  { %2134 = vmatmul.msk.f32.gmra.mxu1 %vm327_vm2, %v810_v42 }
 0x468   :  { %v804_v43 = vpop.xlane.xlu1 %803 }
 0x469   :  { %v2291_v44 = vpop.eup %2290  ;;  %2292 = vrcp.f32 %v804_v43 }
 0x46a   :  { %v811_v45 = vmul.f32 %v2291_v44, %v2279_v11  ;;  %v644_v11 = vpop.f32.mrf.mxu3 }
 0x46b   :  { %v688_v15 = vadd.f32 %v2800_v34, %v644_v11 }
 0x46c   :  { %2135 = vmatmul.msk.f32.vlgmr.msrb.gmra.mxu2 %vm327_vm2, %v811_v45  ;;  %2146 = vmatmul.msk.f32.vlgmr.msra.gmra.mxu1 %vm262_vm1, %v961_v29 }
 0x46d   :  { %2157 = vmatpush.xpose.msk.msrb.mxu2 %vm262_vm1, %v1156_v33 }
 0x46f   :  { %v2293_v46 = vpop.eup %2292 }
 0x470   :  { %v1021_v47 = vpop.xlane.xlu1 %1020  ;;  %v812_v48 = vmul.f32 %v2293_v46, %v2281_v16  ;;  %v1024_v50 = vpop.xlane.xlu2 %1023 }
 0x471   :  { %2294 = vrcp.f32 %v1021_v47 }
 0x472   :  { %2296 = vrcp.f32 %v1024_v50  ;;  %v647_v12 = vpop.f32.mrf.mxu3 }
 0x473   :  { %v691_v23 = vadd.f32 %v2802_v35, %v647_v12 }
 0x474   :  { %2136 = vmatmul.msk.f32.gmra.mxu2 %vm327_vm2, %v812_v48 }
 0x475   :  { %v963_v49 = vpop.permute.xlu0 %962 }
 0x476   :  { %2147 = vmatmul.msk.f32.gmra.mxu1 %vm262_vm1, %v963_v49 }
 0x477   :  { %v2295_v51 = vpop.eup %2294 }
 0x478   :  { %v1035_v52 = vmul.f32 %v2295_v51, %v2283_v21  ;;  %v2297_v53 = vpop.eup %2296  ;;  %v1154_v56 = vpop.permute.xlu2 %1153 }
 0x479   :  { %v1036_v54 = vmul.f32 %v2297_v53, %v2285_v22 }
 0x47a   :  { %v650_v13 = vpop.f32.mrf.mxu3 }
 0x47b   :  { %v694_v34 = vadd.f32 %v2805_v37, %v650_v13 }
 0x47c   :  { %2148 = vmatmul.msk.f32.vlgmr.msra.gmra.mxu2 %vm327_vm2, %v1035_v52 }
 0x482   :  { %v2868_v14 = vpop.f32.mrf.mxu3 }
 0x484   :  { %2149 = vmatmul.msk.f32.gmra.mxu2 %vm327_vm2, %v1036_v54 }
 0x488   :  { %v1152_v55 = vpop.permute.xlu1 %1151 }
 0x48c   :  { %2158 = vmatmul.msk.f32.vlgmr.msrb.gmra.mxu2 %vm262_vm1, %v1152_v55 }
 0x494   :  { %2159 = vmatmul.msk.f32.gmra.mxu2 %vm262_vm1, %v1154_v56 }
 0x4d9   :  { %v839_v59 = vpop.f32.mrf.mxu1 }
 0x4da   :  { %2138 = vmatmul.msk.f32.vlgmr.msra.gmra.mxu3 %vm262_vm1, %v839_v59 }
 0x4e1   :  { %v842_v60 = vpop.f32.mrf.mxu1 }
 0x4e2   :  { %2139 = vmatmul.msk.f32.gmra.mxu3 %vm262_vm1, %v842_v60 }
 0x4e9   :  { %v989_v61 = vpop.f32.mrf.mxu1 }
 0x4ea   :  { %v1001_v63 = vsel %vm327_vm2, %v989_v61, -inf }
 0x4eb   :  { %1002 = vmax.xlane.f32.xlu0 %v1001_v63 }
 0x4ef   :  { %v871_v0 = vpop.f32.mrf.mxu2 }
 0x4f0   :  { %2140 = vmatmul.msk.f32.gmra.mxu3 %vm262_vm1, %v871_v0 }
 0x4f3   :  { %v992_v1 = vpop.f32.mrf.mxu1 }
 0x4f4   :  { %v1004_v2 = vsel %vm327_vm2, %v992_v1, -inf }
 0x4f5   :  { %1005 = vmax.xlane.f32.xlu1 %v1004_v2 }
 0x4f7   :  { %v874_v3 = vpop.f32.mrf.mxu2 }
 0x4f8   :  { %2141 = vmatmul.msk.f32.gmra.mxu3 %vm262_vm1, %v874_v3 }
 0x4ff   :  { %v1065_v4 = vpop.f32.mrf.mxu2 }
 0x500   :  { %2153 = vmatmul.msk.f32.vlgmr.msrb.gmra.mxu1 %vm262_vm1, %v1065_v4 }
 0x507   :  { %v1068_v5 = vpop.f32.mrf.mxu2 }
 0x508   :  { %2154 = vmatmul.msk.f32.gmra.mxu1 %vm262_vm1, %v1068_v5 }
 0x50e   :  { %1186 = vrot.lane.b32.xlu1 %v2695_v28, %s2559_s1 }
 0x50f   :  { %v1180_v6 = vpop.f32.mrf.mxu2 }
 0x510   :  { %v1221_v8 = vsel %vm327_vm2, %v1180_v6, -inf }
 0x511   :  { %1222 = vmax.xlane.f32.xlu2 %v1221_v8 }
 0x517   :  { %v1183_v9 = vpop.f32.mrf.mxu2 }
 0x518   :  { %v1224_v10 = vsel %vm327_vm2, %v1183_v9, -inf }
 0x519   :  { %1225 = vmax.xlane.f32.xlu0 %v1224_v10 }
 0x529   :  { %1190 = vrot.lane.b32.xlu2 %v2683_v24, %s2559_s1 }
 0x52d   :  { %1071 = vrot.lane.b32.xlu0 %v2735_v7, %s2558_s26 }
 0x55d   :  { %v909_v16 = vpop.f32.mrf.mxu3 }
 0x55e   :  { %v921_v17 = vadd.f32 %v909_v16, %v688_v15  ;;  %v1003_v18 = vpop.xlane.xlu0 %1002 }
 0x55f   :  { %v1009_v21 = vsub.f32 %v989_v61, %v1003_v18 }
 0x561   :  { %v1015_v22 = vmul.f32 1.442695, %v1009_v21 }
 0x563   :  { %2298 = vpow2.f32 %v1015_v22 }
 0x565   :  { %v912_v26 = vpop.f32.mrf.mxu3 }
 0x566   :  { %v2872_v27 = vadd.f32 %v912_v26, %v691_v23 }
 0x568   :  { %v1006_v29 = vpop.xlane.xlu1 %1005 }
 0x569   :  { %v2299_v30 = vpop.eup %2298  ;;  %v1010_v32 = vsub.f32 %v992_v1, %v1006_v29 }
 0x56a   :  { %v1025_v33 = vsel %vm327_vm2, %v2299_v30, 0.0 }
 0x56b   :  { %v1017_v36 = vmul.f32 1.442695, %v1010_v32  ;;  %1026 = vadd.xlane.f32.xlu1 %v1025_v33 }
 0x56d   :  { %2300 = vpow2.f32 %v1017_v36 }
 0x573   :  { %v2301_v38 = vpop.eup %2300  ;;  %v915_v40 = vpop.f32.mrf.mxu3 }
 0x574   :  { %v2876_v41 = vadd.f32 %v915_v40, %v694_v34  ;;  %v1028_v42 = vsel %vm327_vm2, %v2301_v38, 0.0 }
 0x575   :  { %1029 = vadd.xlane.f32.xlu2 %v1028_v42 }
 0x57b   :  { %v2904_v3 = vpop.f32.mrf.mxu3 }
 0x57d   :  { %v1135_v35 = vpop.f32.mrf.mxu1 }
 0x57e   :  { %v2879_v43 = vadd.f32 %v1135_v35, %v921_v17  ;;  %v260_v17 = vld [vmem:[#allocation11 + $0x10] sm:$0xff] }
 0x57f   :  { %v1555_v18 = vrot.slane %v260_v17, 4 }
 0x580   :  { %v1187_v50 = vpop.permute.xlu1 %1186 }
 0x584   :  { %v1223_v44 = vpop.xlane.xlu2 %1222 }
 0x585   :  { %v1233_v45 = vsub.f32 %v1180_v6, %v1223_v44  ;;  %v2926_v44 = vpop.f32.mrf.mxu1 }
 0x587   :  { %v1237_v46 = vmul.f32 1.442695, %v1233_v45 }
 0x589   :  { %2302 = vpow2.f32 %v1237_v46 }
 0x58c   :  { %v1226_v47 = vpop.xlane.xlu0 %1225  ;;  %v1191_v48 = vpop.permute.xlu2 %1190 }
 0x58d   :  { %v1234_v49 = vsub.f32 %v1183_v9, %v1226_v47  ;;  %1265 = vrot.lane.b32.xlu2 %v2727_v62, %s2559_s1  ;;  %2160 = vmatpush.xpose.msk.msrb.mxu3 %vm262_vm1, %v1191_v48 }
 0x58f   :  { %v2303_v37 = vpop.eup %2302  ;;  %v1239_v51 = vmul.f32 1.442695, %v1234_v49 }
 0x590   :  { %2161 = vmatmul.msk.f32.vlgmr.msrb.gmra.mxu3 %vm262_vm1, %v1187_v50  ;;  %v1245_v52 = vsel %vm327_vm2, %v2303_v37, 0.0 }
 0x591   :  { %2304 = vpow2.f32 %v1239_v51  ;;  %1246 = vadd.xlane.f32.xlu1 %v1245_v52  ;;  %2167 = vmatpush.msk.msra.mxu3 %vm624_vm3, %v260_v17 }
 0x595   :  { %1381 = vrot.lane.b32.xlu2 %v2673_v19, %s2560_s4 }
 0x597   :  { %v2305_v53 = vpop.eup %2304 }
 0x598   :  { %v1248_v54 = vsel %vm327_vm2, %v2305_v53, 0.0 }
 0x599   :  { %1249 = vadd.xlane.f32.xlu0 %v1248_v54 }
 0x59d   :  { %1379 = vrot.lane.b32.xlu2 %v2685_v25, %s2560_s4 }
 0x59f   :  { %v1072_v55 = vpop.permute.xlu0 %1071 }
 0x5a0   :  { %1095 = vmatpush.msra.mxu0 %v1072_v55 }
 0x5a5   :  { %1412 = vrot.lane.b32.xlu2 %v2695_v28, %s2560_s4 }
 0x5aa   :  { %1188 = vrot.lane.b32.xlu1 %v2699_v31, %s2559_s1 }
 0x5ad   :  { %1414 = vrot.lane.b32.xlu2 %v2699_v31, %s2560_s4 }
 0x5b2   :  { %1377 = vrot.lane.b32.xlu1 %v2675_v20, %s2560_s4 }
 0x5ba   :  { %1416 = vrot.lane.b32.xlu1 %v2683_v24, %s2560_s4 }
 0x5de   :  { %v1027_v56 = vpop.xlane.xlu1 %1026 }
 0x5df   :  { %2306 = vrcp.f32 %v1027_v56 }
 0x5e5   :  { %v2307_v57 = vpop.eup %2306 }
 0x5e6   :  { %v1037_v58 = vmul.f32 %v2307_v57, %v2299_v30 }
 0x5e8   :  { %2150 = vmatmul.msk.f32.vlgmr.msra.gmra.mxu0 %vm327_vm2, %v1037_v58  ;;  %v1030_v59 = vpop.xlane.xlu2 %1029 }
 0x5e9   :  { %2308 = vrcp.f32 %v1030_v59 }
 0x5ef   :  { %v2309_v60 = vpop.eup %2308 }
 0x5f0   :  { %v1266_v61 = vpop.permute.xlu2 %1265  ;;  %v1038_v63 = vmul.f32 %v2309_v60, %v2301_v38 }
 0x5f1   :  { %1289 = vmatpush.msrb.mxu0 %v1266_v61 }
 0x5f2   :  { %2151 = vmatmul.msk.f32.gmra.mxu0 %vm327_vm2, %v1038_v63 }
 0x5f8   :  { %v1382_v0 = vpop.permute.xlu2 %1381 }
 0x5f9   :  { %2172 = vmatpush.xpose.msk.msra.mxu0 %vm262_vm1, %v1382_v0 }
 0x600   :  { %v1380_v13 = vpop.permute.xlu2 %1379 }
 0x604   :  { %v1247_v1 = vpop.xlane.xlu1 %1246 }
 0x605   :  { %2310 = vrcp.f32 %v1247_v1 }
 0x608   :  { %v1413_v22 = vpop.permute.xlu2 %1412 }
 0x60b   :  { %v2311_v2 = vpop.eup %2310 }
 0x60c   :  { %v1261_v4 = vmul.f32 %v2311_v2, %v2303_v37  ;;  %v1250_v5 = vpop.xlane.xlu0 %1249 }
 0x60d   :  { %2312 = vrcp.f32 %v1250_v5 }
 0x60e   :  { %2163 = vmatmul.msk.f32.vlgmr.msrb.gmra.mxu0 %vm327_vm2, %v1261_v4 }
 0x610   :  { %v1415_v23 = vpop.permute.xlu2 %1414 }
 0x613   :  { %v2313_v6 = vpop.eup %2312  ;;  %v1215_v8 = vpop.f32.mrf.mxu3 }
 0x614   :  { %v1227_v9 = vsel %vm327_vm2, %v1215_v8, -inf  ;;  %v1262_v10 = vmul.f32 %v2313_v6, %v2305_v53 }
 0x615   :  { %1228 = vmax.xlane.f32.xlu1 %v1227_v9 }
 0x616   :  { %2164 = vmatmul.msk.f32.gmra.mxu0 %vm327_vm2, %v1262_v10 }
 0x61c   :  { %v1189_v11 = vpop.permute.xlu1 %1188 }
 0x61d   :  { %2162 = vmatmul.msk.f32.gmra.mxu3 %vm262_vm1, %v1189_v11 }
 0x624   :  { %v1378_v12 = vpop.permute.xlu1 %1377 }
 0x625   :  { %2173 = vmatmul.msk.f32.vlgmr.msra.gmra.mxu0 %vm262_vm1, %v1378_v12 }
 0x62c   :  { %v1417_v15 = vpop.permute.xlu1 %1416 }
 0x62d   :  { %2174 = vmatmul.msk.f32.gmra.mxu0 %vm262_vm1, %v1380_v13  ;;  %2175 = vmatpush.xpose.msk.msra.mxu1 %vm262_vm1, %v1417_v15 }
 0x631   :  { %2182 = vmatpush.msk.msrb.mxu1 %vm624_vm3, %v1555_v18 }
 0x665   :  { %v1097_v16 = vpop.f32.mrf.mxu0 }
 0x666   :  { %2155 = vmatmul.msk.f32.gmra.mxu1 %vm262_vm1, %v1097_v16 }
 0x66f   :  { %v1100_v21 = vpop.f32.mrf.mxu0 }
 0x670   :  { %2156 = vmatmul.msk.f32.gmra.mxu1 %vm262_vm1, %v1100_v21 }
 0x678   :  { %2176 = vmatmul.msk.f32.vlgmr.msra.gmra.mxu1 %vm262_vm1, %v1413_v22 }
 0x680   :  { %2177 = vmatmul.msk.f32.gmra.mxu1 %vm262_vm1, %v1415_v23 }
 0x688   :  { %v1229_v30 = vpop.xlane.xlu1 %1228 }
 0x689   :  { %v1235_v32 = vsub.f32 %v1215_v8, %v1229_v30 }
 0x68b   :  { %v1291_v26 = vpop.f32.mrf.mxu0  ;;  %v1241_v33 = vmul.f32 1.442695, %v1235_v32 }
 0x68c   :  { %2168 = vmatmul.msk.f32.vlgmr.msra.gmra.mxu3 %vm262_vm1, %v1291_v26 }
 0x68d   :  { %2314 = vpow2.f32 %v1241_v33 }
 0x693   :  { %v1294_v29 = vpop.f32.mrf.mxu0  ;;  %v2315_v42 = vpop.eup %2314 }
 0x694   :  { %2169 = vmatmul.msk.f32.gmra.mxu3 %vm262_vm1, %v1294_v29  ;;  %v1251_v35 = vsel %vm327_vm2, %v2315_v42, 0.0 }
 0x6a0   :  { %v1218_v36 = vpop.f32.mrf.mxu3 }
 0x6a1   :  { %v1230_v34 = vsel %vm327_vm2, %v1218_v36, -inf }
 0x6a2   :  { %1231 = vmax.xlane.f32.xlu0 %v1230_v34  ;;  %v1406_v38 = vpop.f32.mrf.mxu0 }
 0x6a3   :  { %v1447_v40 = vsel %vm327_vm2, %v1406_v38, -inf }
 0x6a4   :  { %1448 = vmax.xlane.f32.xlu2 %v1447_v40 }
 0x6aa   :  { %1252 = vadd.xlane.f32.xlu0 %v1251_v35 }
 0x6bc   :  { %1491 = vrot.lane.b32.xlu2 %v2727_v62, %s2560_s4 }
 0x6e3   :  { %v1141_v45 = vpop.f32.mrf.mxu1 }
 0x6e4   :  { %v2929_v46 = vadd.f32 %v1141_v45, %v2876_v41 }
 0x6ed   :  { %v2931_v47 = vpop.f32.mrf.mxu1 }
 0x6f5   :  { %v2933_v48 = vpop.f32.mrf.mxu1 }
 0x6f6   :  { %v1453_v4 = vsel %vm327_vm2, %v2933_v48, -inf }
 0x6fd   :  { %v1444_v49 = vpop.f32.mrf.mxu1 }
 0x6fe   :  { %v1456_v37 = vsel %vm327_vm2, %v1444_v49, -inf }
 0x6ff   :  { %1457 = vmax.xlane.f32.xlu2 %v1456_v37 }
 0x70f   :  { %v1361_v50 = vpop.f32.mrf.mxu3 }
 0x710   :  { %v2937_v51 = vadd.f32 %v1361_v50, %v2879_v43  ;;  %v1409_v43 = vpop.f32.mrf.mxu0 }
 0x711   :  { %v1450_v61 = vsel %vm327_vm2, %v1409_v43, -inf }
 0x715   :  { %v1232_v52 = vpop.xlane.xlu0 %1231 }
 0x716   :  { %v1236_v53 = vsub.f32 %v1218_v36, %v1232_v52 }
 0x717   :  { %1523 = vrot.lane.b32.xlu2 %v2735_v7, %s2560_s4  ;;  %v1449_v54 = vpop.xlane.xlu2 %1448 }
 0x718   :  { %v1243_v41 = vmul.f32 1.442695, %v1236_v53  ;;  %v1459_v55 = vsub.f32 %v1406_v38, %v1449_v54 }
 0x71a   :  { %2316 = vpow2.f32 %v1243_v41  ;;  %v1463_v56 = vmul.f32 1.442695, %v1459_v55 }
 0x71c   :  { %2318 = vpow2.f32 %v1463_v56 }
 0x71d   :  { %v1253_v9 = vpop.xlane.xlu0 %1252 }
 0x71f   :  { %v1492_v63 = vpop.permute.xlu2 %1491 }
 0x720   :  { %v2317_v57 = vpop.eup %2316 }
 0x721   :  { %v1254_v58 = vsel %vm327_vm2, %v2317_v57, 0.0 }
 0x722   :  { %v2319_v59 = vpop.eup %2318  ;;  %1255 = vadd.xlane.f32.xlu0 %v1254_v58 }
 0x723   :  { %v1471_v60 = vsel %vm327_vm2, %v2319_v59, 0.0 }
 0x724   :  { %1472 = vadd.xlane.f32.xlu1 %v1471_v60 }
 0x72a   :  { %1451 = vmax.xlane.f32.xlu0 %v1450_v61 }
 0x73e   :  { %1297 = vrot.lane.b32.xlu0 %v2735_v7, %s2559_s1 }
 0x746   :  { %1607 = vrot.lane.b32.xlu0 %v2673_v19, %s2561_s27 }
 0x74e   :  { %1605 = vrot.lane.b32.xlu0 %v2685_v25, %s2561_s27 }
 0x772   :  { %v1458_v0 = vpop.xlane.xlu2 %1457 }
 0x773   :  { %v1462_v1 = vsub.f32 %v1444_v49, %v1458_v0 }
 0x775   :  { %v1469_v2 = vmul.f32 1.442695, %v1462_v1 }
 0x777   :  { %2320 = vpow2.f32 %v1469_v2 }
 0x778   :  { %1454 = vmax.xlane.f32.xlu0 %v1453_v4 }
 0x77a   :  { %v1524_v5 = vpop.permute.xlu2 %1523 }
 0x77b   :  { %1547 = vmatpush.msrb.mxu0 %v1524_v5 }
 0x77d   :  { %v2321_v6 = vpop.eup %2320 }
 0x77e   :  { %v1480_v8 = vsel %vm327_vm2, %v2321_v6, 0.0 }
 0x780   :  { %1481 = vadd.xlane.f32.xlu0 %v1480_v8 }
 0x795   :  { %v1256_v10 = vpop.xlane.xlu0 %1255 }
 0x797   :  { %v1473_v22 = vpop.xlane.xlu1 %1472 }
 0x79d   :  { %v1452_v11 = vpop.xlane.xlu0 %1451 }
 0x79e   :  { %v1460_v12 = vsub.f32 %v1409_v43, %v1452_v11 }
 0x7a0   :  { %v1465_v13 = vmul.f32 1.442695, %v1460_v12 }
 0x7a2   :  { %2322 = vpow2.f32 %v1465_v13 }
 0x7a3   :  { %2324 = vrcp.f32 %v1253_v9 }
 0x7a4   :  { %2326 = vrcp.f32 %v1256_v10 }
 0x7a5   :  { %2328 = vrcp.f32 %v1473_v22 }
 0x7a8   :  { %v2323_v15 = vpop.eup %2322 }
 0x7a9   :  { %v1474_v16 = vsel %vm327_vm2, %v2323_v15, 0.0  ;;  %v2325_v17 = vpop.eup %2324 }
 0x7aa   :  { %1475 = vadd.xlane.f32.xlu1 %v1474_v16  ;;  %v1263_v18 = vmul.f32 %v2325_v17, %v2315_v42  ;;  %v2327_v23 = vpop.eup %2326 }
 0x7ab   :  { %v1264_v29 = vmul.f32 %v2327_v23, %v2317_v57  ;;  %v2329_v30 = vpop.eup %2328 }
 0x7ac   :  { %v1487_v32 = vmul.f32 %v2329_v30, %v2319_v59  ;;  %v2971_v59 = vpop.f32.mrf.mxu3 }
 0x7b0   :  { %v1298_v21 = vpop.permute.xlu0 %1297 }
 0x7b1   :  { %1321 = vmatpush.msra.mxu2 %v1298_v21 }
 0x7b2   :  { %2165 = vmatmul.msk.f32.vlgmr.msra.gmra.mxu2 %vm327_vm2, %v1263_v18 }
 0x7b3   :  { %1515 = vmatpush.msrb.mxu2 %v1492_v63 }
 0x7b8   :  { %v1608_v26 = vpop.permute.xlu0 %1607 }
 0x7b9   :  { %2187 = vmatpush.xpose.msk.msra.mxu2 %vm262_vm1, %v1608_v26 }
 0x7ba   :  { %2166 = vmatmul.msk.f32.gmra.mxu2 %vm327_vm2, %v1264_v29 }
 0x7c0   :  { %v1606_v33 = vpop.permute.xlu0 %1605 }
 0x7c2   :  { %2178 = vmatmul.msk.f32.vlgmr.msrb.gmra.mxu2 %vm327_vm2, %v1487_v32 }
 0x7c3   :  { %1603 = vrot.lane.b32.xlu1 %v2675_v20, %s2561_s27 }
 0x7eb   :  { %v1455_v36 = vpop.xlane.xlu0 %1454 }
 0x7ec   :  { %v1461_v34 = vsub.f32 %v2933_v48, %v1455_v36 }
 0x7ee   :  { %v1467_v38 = vmul.f32 1.442695, %v1461_v34 }
 0x7f0   :  { %2330 = vpow2.f32 %v1467_v38 }
 0x7f3   :  { %v1482_v54 = vpop.xlane.xlu0 %1481 }
 0x7f6   :  { %v2331_v40 = vpop.eup %2330 }
 0x7f7   :  { %v1477_v42 = vsel %vm327_vm2, %v2331_v40, 0.0 }
 0x7f8   :  { %1478 = vadd.xlane.f32.xlu1 %v1477_v42 }
 0x81d   :  { %v1476_v35 = vpop.xlane.xlu1 %1475 }
 0x81e   :  { %2332 = vrcp.f32 %v1476_v35 }
 0x824   :  { %v2333_v45 = vpop.eup %2332 }
 0x825   :  { %v1488_v49 = vmul.f32 %v2333_v45, %v2323_v15 }
 0x827   :  { %2179 = vmatmul.msk.f32.gmra.mxu2 %vm327_vm2, %v1488_v49 }
 0x835   :  { %v1323_v37 = vpop.f32.mrf.mxu2  ;;  %v1604_v50 = vpop.permute.xlu1 %1603 }
 0x836   :  { %2170 = vmatmul.msk.f32.gmra.mxu3 %vm262_vm1, %v1323_v37  ;;  %2188 = vmatmul.msk.f32.vlgmr.msra.gmra.mxu2 %vm262_vm1, %v1604_v50  ;;  %v261_v37 = vld [vmem:[#allocation11 + $0x18] sm:$0xff] }
 0x837   :  { %v2007_v50 = vrot.slane %v261_v37, 4 }
 0x83d   :  { %v1326_v52 = vpop.f32.mrf.mxu2 }
 0x83e   :  { %2171 = vmatmul.msk.f32.gmra.mxu3 %vm262_vm1, %v1326_v52  ;;  %2189 = vmatmul.msk.f32.gmra.mxu2 %vm262_vm1, %v1606_v33 }
 0x845   :  { %v1517_v48 = vpop.f32.mrf.mxu2 }
 0x846   :  { %2183 = vmatmul.msk.f32.vlgmr.msrb.gmra.mxu1 %vm262_vm1, %v1517_v48 }
 0x86b   :  { %v1479_v53 = vpop.xlane.xlu1 %1478 }
 0x86c   :  { %2334 = vrcp.f32 %v1479_v53 }
 0x86d   :  { %2336 = vrcp.f32 %v1482_v54 }
 0x872   :  { %v2335_v41 = vpop.eup %2334 }
 0x873   :  { %v1489_v55 = vmul.f32 %v2335_v41, %v2331_v40  ;;  %v2337_v56 = vpop.eup %2336 }
 0x874   :  { %v1490_v57 = vmul.f32 %v2337_v56, %v2321_v6 }
 0x875   :  { %2180 = vmatmul.msk.f32.vlgmr.msrb.gmra.mxu0 %vm327_vm2, %v1489_v55 }
 0x87d   :  { %2181 = vmatmul.msk.f32.gmra.mxu0 %vm327_vm2, %v1490_v57 }
 0x8aa   :  { %v1520_v58 = vpop.f32.mrf.mxu2 }
 0x8ab   :  { %2184 = vmatmul.msk.f32.gmra.mxu1 %vm262_vm1, %v1520_v58 }
 0x8b9   :  { %v1367_v60 = vpop.f32.mrf.mxu3  ;;  %v1632_v43 = vpop.f32.mrf.mxu2 }
 0x8ba   :  { %v1375_v61 = vadd.f32 %v1367_v60, %v2929_v46  ;;  %v1673_v63 = vsel %vm327_vm2, %v1632_v43, -inf }
 0x8bb   :  { %1674 = vmax.xlane.f32.xlu0 %v1673_v63 }
 0x8c1   :  { %v1635_v0 = vpop.f32.mrf.mxu2 }
 0x8c2   :  { %v1676_v1 = vsel %vm327_vm2, %v1635_v0, -inf }
 0x8c3   :  { %1677 = vmax.xlane.f32.xlu1 %v1676_v1  ;;  %v3001_v18 = vpop.f32.mrf.mxu1 }
 0x8cf   :  { %1638 = vrot.lane.b32.xlu0 %v2695_v28, %s2561_s27 }
 0x8dc   :  { %1642 = vrot.lane.b32.xlu1 %v2683_v24, %s2561_s27 }
 0x8e4   :  { %1640 = vrot.lane.b32.xlu1 %v2699_v31, %s2561_s27 }
 0x8ec   :  { %1829 = vrot.lane.b32.xlu1 %v2675_v20, %s2562_s28 }
 0x8f2   :  { %v1549_v46 = vpop.f32.mrf.mxu0 }
 0x8f3   :  { %2185 = vmatmul.msk.f32.gmra.mxu1 %vm262_vm1, %v1549_v46 }
 0x8f4   :  { %1868 = vrot.lane.b32.xlu1 %v2683_v24, %s2562_s28 }
 0x8fa   :  { %v1552_v2 = vpop.f32.mrf.mxu0 }
 0x8fb   :  { %2186 = vmatmul.msk.f32.gmra.mxu1 %vm262_vm1, %v1552_v2 }
 0x928   :  { %v3006_v22 = vpop.f32.mrf.mxu1 }
 0x92e   :  { %v1675_v4 = vpop.xlane.xlu0 %1674 }
 0x92f   :  { %v1685_v5 = vsub.f32 %v1632_v43, %v1675_v4 }
 0x931   :  { %v1689_v6 = vmul.f32 1.442695, %v1685_v5 }
 0x933   :  { %2338 = vpow2.f32 %v1689_v6 }
 0x936   :  { %v1678_v8 = vpop.xlane.xlu1 %1677 }
 0x937   :  { %v1686_v9 = vsub.f32 %v1635_v0, %v1678_v8 }
 0x939   :  { %v2339_v10 = vpop.eup %2338  ;;  %v1691_v11 = vmul.f32 1.442695, %v1686_v9 }
 0x93a   :  { %v1697_v12 = vsel %vm327_vm2, %v2339_v10, 0.0 }
 0x93b   :  { %2340 = vpow2.f32 %v1691_v11  ;;  %1698 = vadd.xlane.f32.xlu0 %v1697_v12 }
 0x941   :  { %v2341_v20 = vpop.eup %2340  ;;  %v1639_v15 = vpop.permute.xlu0 %1638 }
 0x942   :  { %v1700_v13 = vsel %vm327_vm2, %v2341_v20, 0.0 }
 0x943   :  { %1701 = vadd.xlane.f32.xlu2 %v1700_v13 }
 0x94e   :  { %v1643_v24 = vpop.permute.xlu1 %1642 }
 0x94f   :  { %2190 = vmatpush.xpose.msk.msrb.mxu3 %vm262_vm1, %v1643_v24  ;;  %1717 = vrot.lane.b32.xlu0 %v2727_v62, %s2561_s27 }
 0x952   :  { %2191 = vmatmul.msk.f32.vlgmr.msrb.gmra.mxu3 %vm262_vm1, %v1639_v15 }
 0x953   :  { %2197 = vmatpush.msk.msra.mxu3 %vm624_vm3, %v261_v37 }
 0x956   :  { %v1641_v16 = vpop.permute.xlu1 %1640 }
 0x957   :  { %1833 = vrot.lane.b32.xlu0 %v2673_v19, %s2562_s28 }
 0x95a   :  { %2192 = vmatmul.msk.f32.gmra.mxu3 %vm262_vm1, %v1641_v16 }
 0x95b   :  { %1866 = vrot.lane.b32.xlu2 %v2699_v31, %s2562_s28 }
 0x95e   :  { %v1830_v17 = vpop.permute.xlu1 %1829 }
 0x95f   :  { %1831 = vrot.lane.b32.xlu0 %v2685_v25, %s2562_s28 }
 0x966   :  { %v1869_v21 = vpop.permute.xlu1 %1868 }
 0x967   :  { %2205 = vmatpush.xpose.msk.msra.mxu1 %vm262_vm1, %v1869_v21  ;;  %1864 = vrot.lane.b32.xlu0 %v2695_v28, %s2562_s28  ;;  %v3013_v28 = vpop.f32.mrf.mxu3 }
 0x96b   :  { %2212 = vmatpush.msk.msrb.mxu1 %vm624_vm3, %v2007_v50 }
 0x970   :  { %v1593_v19 = vpop.f32.mrf.mxu1 }
 0x971   :  { %v3008_v23 = vadd.f32 %v1593_v19, %v1375_v61 }
 0x978   :  { %v3025_v54 = vpop.f32.mrf.mxu1 }
 0x9ae   :  { %v1699_v26 = vpop.xlane.xlu0 %1698 }
 0x9af   :  { %2342 = vrcp.f32 %v1699_v26 }
 0x9b5   :  { %v2343_v29 = vpop.eup %2342 }
 0x9b6   :  { %v1702_v31 = vpop.xlane.xlu2 %1701  ;;  %v1713_v30 = vmul.f32 %v2343_v29, %v2339_v10 }
 0x9b7   :  { %2344 = vrcp.f32 %v1702_v31 }
 0x9bd   :  { %v2345_v32 = vpop.eup %2344 }
 0x9be   :  { %v1714_v36 = vmul.f32 %v2345_v32, %v2341_v20  ;;  %v1867_v49 = vpop.permute.xlu2 %1866 }
 0x9c1   :  { %v1718_v25 = vpop.permute.xlu0 %1717 }
 0x9c2   :  { %1741 = vmatpush.msra.mxu0 %v1718_v25 }
 0x9c3   :  { %2193 = vmatmul.msk.f32.vlgmr.msra.gmra.mxu0 %vm327_vm2, %v1713_v30 }
 0x9c9   :  { %v1834_v33 = vpop.permute.xlu0 %1833 }
 0x9ca   :  { %2202 = vmatpush.xpose.msk.msrb.mxu0 %vm262_vm1, %v1834_v33 }
 0x9cb   :  { %2194 = vmatmul.msk.f32.gmra.mxu0 %vm327_vm2, %v1714_v36 }
 0x9d1   :  { %v1832_v34 = vpop.permute.xlu0 %1831 }
 0x9d3   :  { %2203 = vmatmul.msk.f32.vlgmr.msrb.gmra.mxu0 %vm262_vm1, %v1830_v17 }
 0x9d5   :  { %v1667_v38 = vpop.f32.mrf.mxu3 }
 0x9d6   :  { %v1679_v40 = vsel %vm327_vm2, %v1667_v38, -inf }
 0x9d7   :  { %1680 = vmax.xlane.f32.xlu1 %v1679_v40 }
 0x9d9   :  { %v1865_v42 = vpop.permute.xlu0 %1864 }
 0x9da   :  { %2206 = vmatmul.msk.f32.vlgmr.msra.gmra.mxu1 %vm262_vm1, %v1865_v42 }
 0x9db   :  { %2204 = vmatmul.msk.f32.gmra.mxu0 %vm262_vm1, %v1832_v34 }
 0x9dd   :  { %v1670_v35 = vpop.f32.mrf.mxu3 }
 0x9de   :  { %v1682_v45 = vsel %vm327_vm2, %v1670_v35, -inf }
 0x9df   :  { %1683 = vmax.xlane.f32.xlu0 %v1682_v45 }
 0x9e2   :  { %2207 = vmatmul.msk.f32.gmra.mxu1 %vm262_vm1, %v1867_v49 }
 0xa40   :  { %v1743_v52 = vpop.f32.mrf.mxu0 }
 0xa41   :  { %2198 = vmatmul.msk.f32.vlgmr.msra.gmra.mxu3 %vm262_vm1, %v1743_v52 }
 0xa48   :  { %v1746_v48 = vpop.f32.mrf.mxu0 }
 0xa49   :  { %2199 = vmatmul.msk.f32.gmra.mxu3 %vm262_vm1, %v1746_v48 }
 0xa4a   :  { %v1681_v53 = vpop.xlane.xlu1 %1680 }
 0xa4b   :  { %v1687_v41 = vsub.f32 %v1667_v38, %v1681_v53 }
 0xa4d   :  { %v1693_v57 = vmul.f32 1.442695, %v1687_v41 }
 0xa4f   :  { %2346 = vpow2.f32 %v1693_v57 }
 0xa50   :  { %v1858_v55 = vpop.f32.mrf.mxu0 }
 0xa51   :  { %v1899_v56 = vsel %vm327_vm2, %v1858_v55, -inf }
 0xa52   :  { %1900 = vmax.xlane.f32.xlu2 %v1899_v56  ;;  %v1684_v58 = vpop.xlane.xlu0 %1683 }
 0xa53   :  { %v1688_v43 = vsub.f32 %v1670_v35, %v1684_v58 }
 0xa55   :  { %v1695_v1 = vmul.f32 1.442695, %v1688_v43  ;;  %v2347_v46 = vpop.eup %2346 }
 0xa56   :  { %v1703_v4 = vsel %vm327_vm2, %v2347_v46, 0.0 }
 0xa57   :  { %v1893_v60 = vpop.f32.mrf.mxu1  ;;  %2348 = vpow2.f32 %v1695_v1 }
 0xa58   :  { %v1861_v61 = vpop.f32.mrf.mxu0  ;;  %v1905_v63 = vsel %vm327_vm2, %v1893_v60, -inf }
 0xa59   :  { %1906 = vmax.xlane.f32.xlu0 %v1905_v63  ;;  %v1902_v0 = vsel %vm327_vm2, %v1861_v61, -inf }
 0xa5a   :  { %1903 = vmax.xlane.f32.xlu1 %v1902_v0 }
 0xa5d   :  { %v2349_v6 = vpop.eup %2348 }
 0xa5e   :  { %v1706_v8 = vsel %vm327_vm2, %v2349_v6, 0.0 }
 0xa5f   :  { %v1896_v2 = vpop.f32.mrf.mxu1 }
 0xa60   :  { %v1908_v5 = vsel %vm327_vm2, %v1896_v2, -inf }
 0xa61   :  { %1704 = vadd.xlane.f32.xlu0 %v1703_v4 }
 0xa62   :  { %1909 = vmax.xlane.f32.xlu1 %v1908_v5  ;;  %v1599_v5 = vadd.f32 %v3001_v18, %v2937_v51 }
 0xa6a   :  { %1749 = vrot.lane.b32.xlu2 %v2735_v7, %s2561_s27  ;;  %1707 = vadd.xlane.f32.xlu1 %v1706_v8  ;;  %v2241_v8 = vld [vmem:[%s3090_s9] ss:$0 sm:$0xff]  ;;  %s2563_s9 = smov [#allocation13]  }
 0xa6b   :  { %s2071_s11 = sshll.u32 %s2563_s9, 4  ;;  %s2072_s11 = int_to_ptr.vmem [resolvable:$true] %s2071_s11 }
 0xa72   :  { %1975 = vrot.lane.b32.xlu2 %v2735_v7, %s2562_s28 }
 0xac4   :  { %v1813_v4 = vpop.f32.mrf.mxu3 }
 0xac5   :  { %v1901_v9 = vpop.xlane.xlu2 %1900 }
 0xac6   :  { %v1911_v10 = vsub.f32 %v1858_v55, %v1901_v9 }
 0xac8   :  { %v1915_v11 = vmul.f32 1.442695, %v1911_v10  ;;  %v1148_v10 = vadd.f32 %v2926_v44, %v2872_v27 }
 0xaca   :  { %2350 = vpow2.f32 %v1915_v11 }
 0xacc   :  { %v1907_v12 = vpop.xlane.xlu0 %1906 }
 0xacd   :  { %v1904_v20 = vpop.xlane.xlu1 %1903  ;;  %v1750_v13 = vpop.permute.xlu2 %1749  ;;  %v1913_v16 = vsub.f32 %v1893_v60, %v1907_v12 }
 0xace   :  { %v1912_v24 = vsub.f32 %v1861_v61, %v1904_v20  ;;  %1773 = vmatpush.msrb.mxu2 %v1750_v13  ;;  %v1816_v12 = vpop.f32.mrf.mxu3  ;;  %v1374_v20 = vadd.f32 %v2971_v59, %v1148_v10 }
 0xacf   :  { %v1919_v19 = vmul.f32 1.442695, %v1913_v16 }
 0xad0   :  { %v2351_v15 = vpop.eup %2350  ;;  %v1917_v17 = vmul.f32 1.442695, %v1912_v24  ;;  %v1600_v24 = vadd.f32 %v3006_v22, %v1374_v20 }
 0xad1   :  { %v1923_v21 = vsel %vm327_vm2, %v2351_v15, 0.0 }
 0xad2   :  { %2352 = vpow2.f32 %v1917_v17  ;;  %1924 = vadd.xlane.f32.xlu0 %v1923_v21  ;;  %v697_v21 = vadd.f32 %v2808_v39, %v2868_v14 }
 0xad4   :  { %v1705_v26 = vpop.xlane.xlu0 %1704  ;;  %v924_v27 = vadd.f32 %v2904_v3, %v697_v21 }
 0xad5   :  { %2354 = vrcp.f32 %v1705_v26  ;;  %v1910_v7 = vpop.xlane.xlu1 %1909  ;;  %v1976_v31 = vpop.permute.xlu2 %1975 }
 0xad6   :  { %1999 = vmatpush.msra.mxu0 %v1976_v31  ;;  %2356 = vpow2.f32 %v1919_v19  ;;  %v1914_v30 = vsub.f32 %v1896_v2, %v1910_v7  ;;  %v1150_v19 = vadd.f32 %v2931_v47, %v924_v27 }
 0xad8   :  { %v2353_v29 = vpop.eup %2352  ;;  %v1921_v36 = vmul.f32 1.442695, %v1914_v30  ;;  %v1376_v26 = vadd.f32 %v3013_v28, %v1150_v19 }
 0xad9   :  { %v1926_v25 = vsel %vm327_vm2, %v2353_v29, 0.0 }
 0xada   :  { %1927 = vadd.xlane.f32.xlu1 %v1926_v25 }
 0xadb   :  { %v2355_v32 = vpop.eup %2354 }
 0xadc   :  { %v1715_v33 = vmul.f32 %v2355_v32, %v2347_v46  ;;  %v2357_v38 = vpop.eup %2356 }
 0xadd   :  { %v1708_v34 = vpop.xlane.xlu1 %1707  ;;  %v1929_v40 = vsel %vm327_vm2, %v2357_v38, 0.0 }
 0xade   :  { %2358 = vrcp.f32 %v1708_v34  ;;  %2195 = vmatmul.msk.f32.vlgmr.msrb.gmra.mxu2 %vm327_vm2, %v1715_v33 }
 0xadf   :  { %2360 = vpow2.f32 %v1921_v36 }
 0xae2   :  { %1930 = vadd.xlane.f32.xlu1 %v1929_v40 }
 0xae4   :  { %v2359_v42 = vpop.eup %2358 }
 0xae5   :  { %v1716_v35 = vmul.f32 %v2359_v42, %v2349_v6  ;;  %v2361_v45 = vpop.eup %2360  ;;  %v1825_v6 = vadd.f32 %v1813_v4, %v1599_v5 }
 0xae6   :  { %1943 = vrot.lane.b32.xlu0 %v2727_v62, %s2562_s28  ;;  %v1932_v49 = vsel %vm327_vm2, %v2361_v45, 0.0 }
 0xae7   :  { %2196 = vmatmul.msk.f32.gmra.mxu2 %vm327_vm2, %v1716_v35 }
 0xaea   :  { %1933 = vadd.xlane.f32.xlu1 %v1932_v49 }
 0xb45   :  { %v1925_v37 = vpop.xlane.xlu0 %1924 }
 0xb46   :  { %2362 = vrcp.f32 %v1925_v37 }
 0xb4c   :  { %v2363_v52 = vpop.eup %2362 }
 0xb4d   :  { %v1928_v50 = vpop.xlane.xlu1 %1927  ;;  %v1939_v53 = vmul.f32 %v2363_v52, %v2351_v15  ;;  %v1826_v15 = vadd.f32 %v1816_v12, %v1600_v24 }
 0xb55   :  { %v1931_v48 = vpop.xlane.xlu1 %1930 }
 0xb56   :  { %2364 = vrcp.f32 %v1931_v48 }
 0xb57   :  { %2366 = vrcp.f32 %v1928_v50 }
 0xb58   :  { %v1944_v41 = vpop.permute.xlu0 %1943 }
 0xb59   :  { %1967 = vmatpush.msra.mxu2 %v1944_v41 }
 0xb5a   :  { %2208 = vmatmul.msk.f32.vlgmr.msra.gmra.mxu2 %vm327_vm2, %v1939_v53 }
 0xb5c   :  { %v2365_v55 = vpop.eup %2364 }
 0xb5d   :  { %v2367_v56 = vpop.eup %2366  ;;  %v1941_v62 = vmul.f32 %v2365_v55, %v2357_v38  ;;  %v1934_v57 = vpop.xlane.xlu1 %1933 }
 0xb5e   :  { %2368 = vrcp.f32 %v1934_v57  ;;  %v1940_v58 = vmul.f32 %v2367_v56, %v2353_v29  ;;  %v1602_v29 = vadd.f32 %v3025_v54, %v1376_v26 }
 0xb5f   :  { %2210 = vmatmul.msk.f32.vlgmr.msra.gmra.mxu0 %vm327_vm2, %v1941_v62 }
 0xb61   :  { %v1775_v60 = vpop.f32.mrf.mxu2 }
 0xb62   :  { %2200 = vmatmul.msk.f32.gmra.mxu3 %vm262_vm1, %v1775_v60  ;;  %2209 = vmatmul.msk.f32.gmra.mxu2 %vm327_vm2, %v1940_v58 }
 0xb64   :  { %v2369_v43 = vpop.eup %2368 }
 0xb65   :  { %v1942_v61 = vmul.f32 %v2369_v43, %v2361_v45 }
 0xb67   :  { %2211 = vmatmul.msk.f32.gmra.mxu0 %vm327_vm2, %v1942_v61 }
 0xb6a   :  { %v1778_v63 = vpop.f32.mrf.mxu2 }
 0xb6b   :  { %2201 = vmatmul.msk.f32.gmra.mxu3 %vm262_vm1, %v1778_v63 }
 0xbdc   :  { %v2001_v46 = vpop.f32.mrf.mxu0 }
 0xbdd   :  { %v1969_v0 = vpop.f32.mrf.mxu2 }
 0xbde   :  { %2213 = vmatmul.msk.f32.vlgmr.msrb.gmra.mxu1 %vm262_vm1, %v1969_v0 }
 0xbe4   :  { %v2004_v2 = vpop.f32.mrf.mxu0 }
 0xbe5   :  { %v1972_v1 = vpop.f32.mrf.mxu2  ;;  %v1819_v16 = vpop.f32.mrf.mxu3 }
 0xbe6   :  { %2214 = vmatmul.msk.f32.gmra.mxu1 %vm262_vm1, %v1972_v1  ;;  %v1827_v44 = vadd.f32 %v1819_v16, %v3008_v23 }
 0xbee   :  { %2215 = vmatmul.msk.f32.gmra.mxu1 %vm262_vm1, %v2001_v46  ;;  %v1822_v31 = vpop.f32.mrf.mxu3 }
 0xbef   :  { %v1828_v30 = vadd.f32 %v1822_v31, %v1602_v29 }
 0xbf6   :  { %2216 = vmatmul.msk.f32.gmra.mxu1 %vm262_vm1, %v2004_v2 }
 0xc5b   :  { %v2039_v9 = vpop.f32.mrf.mxu1 }
 0xc5c   :  { %v2051_v11 = vadd.f32 %v2039_v9, %v1825_v6 }
 0xc5e   :  { %v2059_v13 = vadd.f32 %v2241_v8, %v2051_v11 }
 0xc60   :  { %2063 = vst.msk [vmem:[#allocation13] sm:$0xff] %vm144_vm0, %v2059_v13 }
 0xc63   :  { %v2042_v51 = vpop.f32.mrf.mxu1 }
 0xc64   :  { %v2052_v18 = vadd.f32 %v2042_v51, %v1826_v15 }
 0xc66   :  { %v2060_v17 = vadd.f32 %v2241_v8, %v2052_v18 }
 0xc68   :  { %2064 = vst.msk [vmem:[#allocation13 + $0x8] sm:$0xff] %vm144_vm0, %v2060_v17 }
 0xc6b   :  { %v2045_v59 = vpop.f32.mrf.mxu1 }
 0xc6c   :  { %v2053_v22 = vadd.f32 %v2045_v59, %v1827_v44 }
 0xc6e   :  { %v2061_v7 = vadd.f32 %v2241_v8, %v2053_v22 }
 0xc70   :  { %2065 = vst.msk [vmem:[#allocation13 + $0x10] sm:$0xff] %vm144_vm0, %v2061_v7 }
 0xc73   :  { %v2048_v39 = vpop.f32.mrf.mxu1 }
 0xc74   :  { %v2054_v14 = vadd.f32 %v2048_v39, %v1828_v30 }
 0xc76   :  { %v2062_v3 = vadd.f32 %v2241_v8, %v2054_v14 }
 0xc78   :  { %2066 = vst.msk [vmem:[#allocation13 + $0x18] sm:$0xff] %vm144_vm0, %v2062_v3 }
 0xc79   :  { %2079 = dma.vmem_to_hbm [thread:$0]  %s2072_s11, 512, %s2074_s13, [#allocation4], %s2549_s21, %s2549_s21, %s2550_s22  }
 0xc7a   :  { %2546 = dma.done.wait [#allocation4], 512  }
 0xc7b   :  { %2547 = vsyncadd [#allocation4], 4294966784 }
 0xc7c   :  { %2084 = vsyncpa [#allocation3], 1 }
 0xc7d   :  { %2085 = vsyncpa [#allocation6], 1 }
 0xc7e   :  { %2086 = vsyncpa [#allocation9], 1 }
 0xc7f   :  { %2087 = vsyncpa [#allocation12], 1 }
 0xc80   :  { %2088 = vsyncpa [#allocation4], 1 }

</bundles_post_ra>
